<compile_context>
chip_gen: v7x
topology: tpu7x:2x2x1
jax: 0.10.0
libtpu: 0.0.40
codegen_flags: <defaults>
</compile_context>

<pallas_src>
import functools

import jax
import jax.numpy as jnp
from jax import lax
from jax.experimental import pallas as pl
from jax.experimental.pallas import tpu as pltpu


# 48 MiB: below v7x's 64 MiB physical VMEM, comfortably below v5e/v6e's 128 MiB.
_VMEM_LIMIT = 48 * 1024 * 1024


def _round_up(x, m):
    return ((x + m - 1) // m) * m


def _pad_cout(fout):
    """Pad fout so it splits into 256-wide lane-dense blocks when large;
    small fout stays a single full-dim block (no wasted HBM bytes)."""
    return fout if fout <= 256 else _round_up(fout, 256)


def _cout_tile(cp):
    return cp if cp <= 256 else 256


def _flatten_pad_rows(x, min_rows):
    """(N, H, W, C) -> (N, rows, C) flat map; rows zero-padded so the shifted
    in-kernel tap windows never read past the end of the buffer."""
    n, h, w, c = x.shape
    flat = x.reshape(n, h * w, c)
    rows = _round_up(max(h * w, min_rows), 8)
    if rows != h * w:
        flat = jnp.pad(flat, ((0, 0), (0, rows - h * w), (0, 0)))
    return flat


# ---------------------------------------------------------------------------
# Kernel 1: stride-1 tap-conv (sum of shifted-window matmuls) + LeakyReLU(0.2)
# ---------------------------------------------------------------------------
def _make_conv_lrelu_kernel(tap_offsets, out_rows):
    def kernel(x_ref, w_ref, o_ref):
        tn = o_ref.shape[-1]
        acc = jnp.zeros((out_rows, tn), jnp.float32)
        for t, off in enumerate(tap_offsets):            # static unroll
            acc += jnp.dot(x_ref[0, off:off + out_rows, :], w_ref[t],
                           preferred_element_type=jnp.float32)
        o_ref[0] = jnp.where(acc >= 0.0, acc, 0.2 * acc).astype(o_ref.dtype)
    return kernel


def _conv_taps_lrelu(x_flat, w_taps, tap_offsets, out_rows, out_dtype):
    """x_flat: (N, L, Cin) bf16, w_taps: (T, Cin, Cp) bf16.
    Returns (N, out_rows, Cp) in out_dtype (valid columns only up to Wo)."""
    n, l, cin = x_flat.shape
    t, _, cp = w_taps.shape
    tn = _cout_tile(cp)
    kernel = _make_conv_lrelu_kernel(tuple(tap_offsets), out_rows)
    return pl.pallas_call(
        kernel,
        out_shape=jax.ShapeDtypeStruct((n, out_rows, cp), out_dtype),
        grid_spec=pltpu.PrefetchScalarGridSpec(
            num_scalar_prefetch=0,
            grid=(n, cp // tn),
            in_specs=[
                pl.BlockSpec((1, l, cin), lambda b, j: (b, 0, 0)),
                pl.BlockSpec((t, cin, tn), lambda b, j: (0, 0, j)),
            ],
            out_specs=pl.BlockSpec((1, out_rows, tn), lambda b, j: (b, 0, j))),
        compiler_params=pltpu.CompilerParams(
            dimension_semantics=("parallel", "parallel"),
            vmem_limit_bytes=_VMEM_LIMIT),
    )(x_flat, w_taps)


# ---------------------------------------------------------------------------
# Kernel 2: tap-conv + LeakyReLU(0.2) with the shortcut fused in the epilogue
#   learned:  o = (xs @ ws + bs) + gamma * lrelu(conv)
#   identity: o =  xs            + gamma * lrelu(conv)
# ---------------------------------------------------------------------------
def _make_conv_lrelu_shortcut_kernel(tap_offsets, out_rows, learned):
    def tap_lrelu(r_ref, w_ref, tn):
        acc = jnp.zeros((out_rows, tn), jnp.float32)
        for t, off in enumerate(tap_offsets):            # static unroll
            acc += jnp.dot(r_ref[0, off:off + out_rows, :], w_ref[t],
                           preferred_element_type=jnp.float32)
        return jnp.where(acc >= 0.0, acc, 0.2 * acc)     # f32 epilogue (v5e-safe)

    if learned:
        def kernel(r_ref, w_ref, xs_ref, ws_ref, bs_ref, gamma_ref, o_ref):
            res = tap_lrelu(r_ref, w_ref, o_ref.shape[-1])
            sc = jnp.dot(xs_ref[0], ws_ref[...],
                         preferred_element_type=jnp.float32) + bs_ref[...]
            o_ref[0] = (sc + gamma_ref[0, 0] * res).astype(o_ref.dtype)
    else:
        def kernel(r_ref, w_ref, xs_ref, gamma_ref, o_ref):
            res = tap_lrelu(r_ref, w_ref, o_ref.shape[-1])
            o_ref[0] = (xs_ref[0].astype(jnp.float32)
                        + gamma_ref[0, 0] * res).astype(o_ref.dtype)
    return kernel


def _conv_taps_lrelu_shortcut(r_flat, w_taps, xs_flat, ws, bs, gamma,
                              tap_offsets, out_rows, learned):
    n, l, cin = r_flat.shape
    t, _, cp = w_taps.shape
    tn = _cout_tile(cp)
    gamma = jnp.asarray(gamma, jnp.float32).reshape(1, 1)
    kernel = _make_conv_lrelu_shortcut_kernel(tuple(tap_offsets), out_rows, learned)

    in_specs = [
        pl.BlockSpec((1, l, cin), lambda b, j: (b, 0, 0)),
        pl.BlockSpec((t, cin, tn), lambda b, j: (0, 0, j)),
    ]
    args = [r_flat, w_taps]
    if learned:
        fin = xs_flat.shape[-1]
        in_specs += [
            pl.BlockSpec((1, out_rows, fin), lambda b, j: (b, 0, 0)),
            pl.BlockSpec((fin, tn), lambda b, j: (0, j)),
            pl.BlockSpec((1, tn), lambda b, j: (0, j)),
        ]
        args += [xs_flat, ws, bs]
    else:
        in_specs += [pl.BlockSpec((1, out_rows, tn), lambda b, j: (b, 0, j))]
        args += [xs_flat]
    in_specs += [pl.BlockSpec((1, 1), lambda b, j: (0, 0),
                              memory_space=pltpu.MemorySpace.SMEM)]
    args += [gamma]

    return pl.pallas_call(
        kernel,
        out_shape=jax.ShapeDtypeStruct((n, out_rows, cp), jnp.float32),
        grid_spec=pltpu.PrefetchScalarGridSpec(
            num_scalar_prefetch=0,
            grid=(n, cp // tn),
            in_specs=in_specs,
            out_specs=pl.BlockSpec((1, out_rows, tn), lambda b, j: (b, 0, j))),
        compiler_params=pltpu.CompilerParams(
            dimension_semantics=("parallel", "parallel"),
            vmem_limit_bytes=_VMEM_LIMIT),
    )(*args)


# ---------------------------------------------------------------------------
# D_Block forward
# ---------------------------------------------------------------------------
def d_block_forward(x_nchw, params, downsample=True):
    """x: (N, fin, H, W) f32 NCHW -> (N, fout, H//2, W//2) f32 NCHW.
    (When stacking D_Blocks, convert NCHW<->NHWC once at the model boundary;
    kept per-block here only to match the PyTorch interface.)"""
    n, fin, h, w = x_nchw.shape
    fout = params["w_r1"].shape[0]
    learned = fin != fout
    if h % 2 or w % 2:
        raise ValueError("D_Block expects even spatial dims")
    if not downsample:
        # conv_r halves the spatial dims, so the residual add only type-checks
        # with downsample=True (same implicit constraint as the PyTorch module).
        raise ValueError("downsample=False is unsupported (spatial mismatch)")

    fout_p = _pad_cout(fout)

    # single NCHW -> NHWC conversion; bf16 cast happens BEFORE any glue copies.
    x = jnp.transpose(x_nchw.astype(jnp.bfloat16), (0, 2, 3, 1))   # (N,H,W,fin)

    # ---- conv1: 4x4 / s2 / p1  ==  2x2 / s1 conv on a space-to-depth map ----
    xp = jnp.pad(x, ((0, 0), (1, 1), (1, 1), (0, 0)))              # (N,H+2,W+2,fin)
    hs, ws_ = (h + 2) // 2, (w + 2) // 2
    xs2d = xp.reshape(n, hs, 2, ws_, 2, fin).transpose(0, 1, 3, 2, 4, 5)
    xs2d = xs2d.reshape(n, hs, ws_, 4 * fin)                       # (N,hs,ws,4*fin)
    ho, wo = h // 2, w // 2
    offs1 = [a2 * ws_ + b2 for a2 in range(2) for b2 in range(2)]
    rows1 = ho * ws_
    x1 = _flatten_pad_rows(xs2d, min_rows=max(offs1) + rows1)

    w1 = params["w_r1"].astype(jnp.bfloat16)                        # (O, I, 4, 4)
    w1 = w1.transpose(2, 3, 1, 0).reshape(2, 2, 2, 2, fin, fout)    # (a2,a,b2,b,I,O)
    w1 = w1.transpose(0, 2, 1, 3, 4, 5).reshape(4, 4 * fin, fout)   # taps,(a,b,I),O
    if fout_p != fout:
        w1 = jnp.pad(w1, ((0, 0), (0, 0), (0, fout_p - fout)))

    y1 = _conv_taps_lrelu(x1, w1, offs1, rows1, jnp.bfloat16)       # (N,rows1,fout_p) bf16

    # ---- conv2 input: keep valid columns, re-pad spatially for k=3 / p=1 ----
    res1 = y1.reshape(n, ho, ws_, fout_p)[:, :, :wo, :fout]         # (N,ho,wo,fout)
    rp = jnp.pad(res1, ((0, 0), (1, 1), (1, 1), (0, 0)))            # (N,ho+2,wo+2,fout)
    wp2 = wo + 2
    offs2 = [di * wp2 + dj for di in range(3) for dj in range(3)]
    rows2 = ho * wp2
    r2 = _flatten_pad_rows(rp, min_rows=max(offs2) + rows2)

    w2 = params["w_r2"].astype(jnp.bfloat16)                        # (O, O, 3, 3)
    w2 = w2.transpose(2, 3, 1, 0).reshape(9, fout, fout)
    if fout_p != fout:
        w2 = jnp.pad(w2, ((0, 0), (0, 0), (0, fout_p - fout)))

    # ---- shortcut: avg-pool at fin channels (pool commutes with the 1x1 conv)
    # laid out row-for-row with conv2's flat output rows (extra cols are junk,
    # discarded at the end anyway).
    xs = jnp.mean(x.reshape(n, ho, 2, wo, 2, fin), axis=(2, 4), dtype=jnp.float32)
    xs = jnp.pad(xs, ((0, 0), (0, 0), (0, wp2 - wo), (0, 0)))       # (N,ho,wp2,fin)
    xs = xs.reshape(n, rows2, fin)

    if learned:
        ws1 = params["w_s"].reshape(fout, fin).T.astype(jnp.bfloat16)   # (fin, fout)
        bs = params["b_s"].astype(jnp.float32).reshape(1, fout)
        if fout_p != fout:
            ws1 = jnp.pad(ws1, ((0, 0), (0, fout_p - fout)))
            bs = jnp.pad(bs, ((0, 0), (0, fout_p - fout)))
        xs = xs.astype(jnp.bfloat16)
    else:
        ws1 = bs = None
        if fout_p != fout:
            xs = jnp.pad(xs, ((0, 0), (0, 0), (0, fout_p - fin)))

    y2 = _conv_taps_lrelu_shortcut(r2, w2, xs, ws1, bs, params["gamma"],
                                   offs2, rows2, learned)           # (N,rows2,fout_p) f32

    out = y2.reshape(n, ho, wp2, fout_p)[:, :, :wo, :fout]
    return jnp.transpose(out, (0, 3, 1, 2))                         # back to NCHW


# ---------------------------------------------------------------------------
# Pure-JAX reference (lax.conv, f32) for validation
# ---------------------------------------------------------------------------
def d_block_reference(x, params):
    dn = ("NCHW", "OIHW", "NCHW")
    lrelu = lambda y: jnp.where(y >= 0.0, y, 0.2 * y)
    res = lrelu(lax.conv_general_dilated(x, params["w_r1"], (2, 2),
                                         ((1, 1), (1, 1)), dimension_numbers=dn))
    res = lrelu(lax.conv_general_dilated(res, params["w_r2"], (1, 1),
                                         ((1, 1), (1, 1)), dimension_numbers=dn))
    xs = lax.conv_general_dilated(x, params["w_s"], (1, 1),
                                  ((0, 0), (0, 0)), dimension_numbers=dn)
    xs = xs + params["b_s"][None, :, None, None]
    n, c, hh, ww = xs.shape
    pooled = jnp.mean(xs.reshape(n, c, hh // 2, 2, ww // 2, 2), axis=(3, 5))
    return pooled + params["gamma"] * res


if __name__ == "__main__":
    fin, fout = 4, 8
    N, H, W = 2, 16, 16

    key = jax.random.PRNGKey(0)
    kx, k1, k2, k3, k4 = jax.random.split(key, 5)
    x = jax.random.normal(kx, (N, fin, H, W), dtype=jnp.float32)

    params = {
        "w_r1": 0.1 * jax.random.normal(k1, (fout, fin, 4, 4), dtype=jnp.float32),
        "w_r2": 0.1 * jax.random.normal(k2, (fout, fout, 3, 3), dtype=jnp.float32),
        "w_s":  0.1 * jax.random.normal(k3, (fout, fin, 1, 1), dtype=jnp.float32),
        "b_s":  0.1 * jax.random.normal(k4, (fout,), dtype=jnp.float32),
        # PyTorch __init__ sets gamma=0; use a nonzero deterministic value so
        # the residual branch actually contributes to the checked output.
        "gamma": jnp.array(0.5, dtype=jnp.float32),
    }

    fwd = jax.jit(functools.partial(d_block_forward, downsample=True))
    out = jax.block_until_ready(fwd(x, params))

    ref = d_block_reference(x, params)
    assert out.shape == (N, fout, H // 2, W // 2), out.shape
    # bf16 MXU inputs (f32 accumulation) -> loosened tolerance vs f32 reference.
    assert jnp.allclose(out, ref, atol=5e-2, rtol=5e-2), \
        float(jnp.max(jnp.abs(out - ref)))

    print("KERNEL_OK")
</pallas_src>

<mosaic_0001>
module attributes {stable_mosaic.version = 11 : i64} {
  func.func @kernel(%arg0: i32, %arg1: i32, %arg2: memref<1x88x16xbf16, #tpu.memory_space<vmem>>, %arg3: memref<4x16x8xbf16, #tpu.memory_space<vmem>>, %arg4: memref<1x72x8xbf16, #tpu.memory_space<vmem>>) attributes {dimension_semantics = [#tpu.dimension_semantics<parallel>, #tpu.dimension_semantics<parallel>], iteration_bounds = array<i64: 2, 1>, scalar_prefetch = 0 : i64, scratch_operands = 0 : i64, tpu.core_type = #tpu.core_type<tc>, window_params = [{transform_indices = @transform_0, window_bounds = array<i64: 1, 88, 16>}, {transform_indices = @transform_1, window_bounds = array<i64: 4, 16, 8>}, {transform_indices = @transform_2, window_bounds = array<i64: 1, 72, 8>}]} {
    %cst = arith.constant 0.000000e+00 : f32
    %0 = vector.broadcast %cst : f32 to vector<72x8xf32>
    %c0 = arith.constant 0 : index
    %c0_0 = arith.constant 0 : index
    %c0_1 = arith.constant 0 : index
    %1 = vector.load %arg2[%c0, %c0_0, %c0_1] : memref<1x88x16xbf16, #tpu.memory_space<vmem>>, vector<1x72x16xbf16>
    %2 = vector.shape_cast %1 : vector<1x72x16xbf16> to vector<72x16xbf16>
    %c0_2 = arith.constant 0 : index
    %c0_3 = arith.constant 0 : index
    %c0_4 = arith.constant 0 : index
    %3 = vector.load %arg3[%c0_2, %c0_3, %c0_4] : memref<4x16x8xbf16, #tpu.memory_space<vmem>>, vector<1x16x8xbf16>
    %4 = vector.shape_cast %3 : vector<1x16x8xbf16> to vector<16x8xbf16>
    %cst_5 = arith.constant dense<0.000000e+00> : vector<72x8xf32>
    %5 = tpu.matmul %2, %4, %cst_5 {dimension_numbers = #tpu.dot_dimension_numbers<[1], [0], [0], [1], [0, 0, 1, 1], [], []>} : vector<72x16xbf16>, vector<16x8xbf16>, vector<72x8xf32> -> vector<72x8xf32>
    %6 = arith.addf %0, %5 : vector<72x8xf32>
    %c0_6 = arith.constant 0 : index
    %c1 = arith.constant 1 : index
    %c0_7 = arith.constant 0 : index
    %7 = vector.load %arg2[%c0_6, %c1, %c0_7] : memref<1x88x16xbf16, #tpu.memory_space<vmem>>, vector<1x72x16xbf16>
    %8 = vector.shape_cast %7 : vector<1x72x16xbf16> to vector<72x16xbf16>
    %c1_8 = arith.constant 1 : index
    %c0_9 = arith.constant 0 : index
    %c0_10 = arith.constant 0 : index
    %9 = vector.load %arg3[%c1_8, %c0_9, %c0_10] : memref<4x16x8xbf16, #tpu.memory_space<vmem>>, vector<1x16x8xbf16>
    %10 = vector.shape_cast %9 : vector<1x16x8xbf16> to vector<16x8xbf16>
    %cst_11 = arith.constant dense<0.000000e+00> : vector<72x8xf32>
    %11 = tpu.matmul %8, %10, %cst_11 {dimension_numbers = #tpu.dot_dimension_numbers<[1], [0], [0], [1], [0, 0, 1, 1], [], []>} : vector<72x16xbf16>, vector<16x8xbf16>, vector<72x8xf32> -> vector<72x8xf32>
    %12 = arith.addf %6, %11 : vector<72x8xf32>
    %c0_12 = arith.constant 0 : index
    %c9 = arith.constant 9 : index
    %c0_13 = arith.constant 0 : index
    %13 = vector.load %arg2[%c0_12, %c9, %c0_13] : memref<1x88x16xbf16, #tpu.memory_space<vmem>>, vector<1x72x16xbf16>
    %14 = vector.shape_cast %13 : vector<1x72x16xbf16> to vector<72x16xbf16>
    %c2 = arith.constant 2 : index
    %c0_14 = arith.constant 0 : index
    %c0_15 = arith.constant 0 : index
    %15 = vector.load %arg3[%c2, %c0_14, %c0_15] : memref<4x16x8xbf16, #tpu.memory_space<vmem>>, vector<1x16x8xbf16>
    %16 = vector.shape_cast %15 : vector<1x16x8xbf16> to vector<16x8xbf16>
    %cst_16 = arith.constant dense<0.000000e+00> : vector<72x8xf32>
    %17 = tpu.matmul %14, %16, %cst_16 {dimension_numbers = #tpu.dot_dimension_numbers<[1], [0], [0], [1], [0, 0, 1, 1], [], []>} : vector<72x16xbf16>, vector<16x8xbf16>, vector<72x8xf32> -> vector<72x8xf32>
    %18 = arith.addf %12, %17 : vector<72x8xf32>
    %c0_17 = arith.constant 0 : index
    %c10 = arith.constant 10 : index
    %c0_18 = arith.constant 0 : index
    %19 = vector.load %arg2[%c0_17, %c10, %c0_18] : memref<1x88x16xbf16, #tpu.memory_space<vmem>>, vector<1x72x16xbf16>
    %20 = vector.shape_cast %19 : vector<1x72x16xbf16> to vector<72x16xbf16>
    %c3 = arith.constant 3 : index
    %c0_19 = arith.constant 0 : index
    %c0_20 = arith.constant 0 : index
    %21 = vector.load %arg3[%c3, %c0_19, %c0_20] : memref<4x16x8xbf16, #tpu.memory_space<vmem>>, vector<1x16x8xbf16>
    %22 = vector.shape_cast %21 : vector<1x16x8xbf16> to vector<16x8xbf16>
    %cst_21 = arith.constant dense<0.000000e+00> : vector<72x8xf32>
    %23 = tpu.matmul %20, %22, %cst_21 {dimension_numbers = #tpu.dot_dimension_numbers<[1], [0], [0], [1], [0, 0, 1, 1], [], []>} : vector<72x16xbf16>, vector<16x8xbf16>, vector<72x8xf32> -> vector<72x8xf32>
    %24 = arith.addf %18, %23 : vector<72x8xf32>
    %cst_22 = arith.constant 0.000000e+00 : f32
    %25 = vector.broadcast %cst_22 : f32 to vector<72x8xf32>
    %26 = arith.cmpf oge, %24, %25 : vector<72x8xf32>
    %cst_23 = arith.constant 2.000000e-01 : f32
    %27 = vector.broadcast %cst_23 : f32 to vector<72x8xf32>
    %28 = arith.mulf %27, %24 : vector<72x8xf32>
    %29 = arith.select %26, %24, %28 : vector<72x8xi1>, vector<72x8xf32>
    %30 = arith.truncf %29 : vector<72x8xf32> to vector<72x8xbf16>
    %c0_24 = arith.constant 0 : index
    %c0_25 = arith.constant 0 : index
    %c0_26 = arith.constant 0 : index
    %31 = vector.load %arg4[%c0_24, %c0_25, %c0_26] : memref<1x72x8xbf16, #tpu.memory_space<vmem>>, vector<1x72x8xbf16>
    %32 = vector.shape_cast %31 : vector<1x72x8xbf16> to vector<72x8xbf16>
    %33 = vector.shape_cast %30 : vector<72x8xbf16> to vector<1x72x8xbf16>
    tpu.vector_store %arg4[%c0_24, %c0_25, %c0_26], %33 {strides = array<i32>} : memref<1x72x8xbf16, #tpu.memory_space<vmem>>, vector<1x72x8xbf16>,
    return
  }
  func.func @transform_0(%arg0: i32, %arg1: i32) -> (i32, i32, i32) {
    %c0_i32 = arith.constant 0 : i32
    %c0_i32_0 = arith.constant 0 : i32
    %c0_i32_1 = arith.constant 0 : i32
    return %arg0, %c0_i32, %c0_i32_0 : i32, i32, i32
  }
  func.func @transform_1(%arg0: i32, %arg1: i32) -> (i32, i32, i32) {
    %c0_i32 = arith.constant 0 : i32
    %c0_i32_0 = arith.constant 0 : i32
    %c0_i32_1 = arith.constant 0 : i32
    return %c0_i32, %c0_i32_0, %arg1 : i32, i32, i32
  }
  func.func @transform_2(%arg0: i32, %arg1: i32) -> (i32, i32, i32) {
    %c0_i32 = arith.constant 0 : i32
    %c0_i32_0 = arith.constant 0 : i32
    return %arg0, %c0_i32, %arg1 : i32, i32, i32
  }
}

module attributes {stable_mosaic.version = 11 : i64} {
  func.func @kernel(%arg0: i32, %arg1: i32, %arg2: memref<1x104x8xbf16, #tpu.memory_space<vmem>>, %arg3: memref<9x8x8xbf16, #tpu.memory_space<vmem>>, %arg4: memref<1x80x4xbf16, #tpu.memory_space<vmem>>, %arg5: memref<4x8xbf16, #tpu.memory_space<vmem>>, %arg6: memref<1x8xf32, #tpu.memory_space<vmem>>, %arg7: memref<1x1xf32, #tpu.memory_space<smem>>, %arg8: memref<1x80x8xf32, #tpu.memory_space<vmem>>) attributes {dimension_semantics = [#tpu.dimension_semantics<parallel>, #tpu.dimension_semantics<parallel>], iteration_bounds = array<i64: 2, 1>, scalar_prefetch = 0 : i64, scratch_operands = 0 : i64, tpu.core_type = #tpu.core_type<tc>, window_params = [{transform_indices = @transform_0, window_bounds = array<i64: 1, 104, 8>}, {transform_indices = @transform_1, window_bounds = array<i64: 9, 8, 8>}, {transform_indices = @transform_2, window_bounds = array<i64: 1, 80, 4>}, {transform_indices = @transform_3, window_bounds = array<i64: 4, 8>}, {transform_indices = @transform_4, window_bounds = array<i64: 1, 8>}, {transform_indices = @transform_5, window_bounds = array<i64: 1, 1>}, {transform_indices = @transform_6, window_bounds = array<i64: 1, 80, 8>}]} {
    %cst = arith.constant 0.000000e+00 : f32
    %0 = vector.broadcast %cst : f32 to vector<80x8xf32>
    %c0 = arith.constant 0 : index
    %c0_0 = arith.constant 0 : index
    %c0_1 = arith.constant 0 : index
    %1 = vector.load %arg2[%c0, %c0_0, %c0_1] : memref<1x104x8xbf16, #tpu.memory_space<vmem>>, vector<1x80x8xbf16>
    %2 = vector.shape_cast %1 : vector<1x80x8xbf16> to vector<80x8xbf16>
    %c0_2 = arith.constant 0 : index
    %c0_3 = arith.constant 0 : index
    %c0_4 = arith.constant 0 : index
    %3 = vector.load %arg3[%c0_2, %c0_3, %c0_4] : memref<9x8x8xbf16, #tpu.memory_space<vmem>>, vector<1x8x8xbf16>
    %4 = vector.shape_cast %3 : vector<1x8x8xbf16> to vector<8x8xbf16>
    %cst_5 = arith.constant dense<0.000000e+00> : vector<80x8xf32>
    %5 = tpu.matmul %2, %4, %cst_5 {dimension_numbers = #tpu.dot_dimension_numbers<[1], [0], [0], [1], [0, 0, 1, 1], [], []>} : vector<80x8xbf16>, vector<8x8xbf16>, vector<80x8xf32> -> vector<80x8xf32>
    %6 = arith.addf %0, %5 : vector<80x8xf32>
    %c0_6 = arith.constant 0 : index
    %c1 = arith.constant 1 : index
    %c0_7 = arith.constant 0 : index
    %7 = vector.load %arg2[%c0_6, %c1, %c0_7] : memref<1x104x8xbf16, #tpu.memory_space<vmem>>, vector<1x80x8xbf16>
    %8 = vector.shape_cast %7 : vector<1x80x8xbf16> to vector<80x8xbf16>
    %c1_8 = arith.constant 1 : index
    %c0_9 = arith.constant 0 : index
    %c0_10 = arith.constant 0 : index
    %9 = vector.load %arg3[%c1_8, %c0_9, %c0_10] : memref<9x8x8xbf16, #tpu.memory_space<vmem>>, vector<1x8x8xbf16>
    %10 = vector.shape_cast %9 : vector<1x8x8xbf16> to vector<8x8xbf16>
    %cst_11 = arith.constant dense<0.000000e+00> : vector<80x8xf32>
    %11 = tpu.matmul %8, %10, %cst_11 {dimension_numbers = #tpu.dot_dimension_numbers<[1], [0], [0], [1], [0, 0, 1, 1], [], []>} : vector<80x8xbf16>, vector<8x8xbf16>, vector<80x8xf32> -> vector<80x8xf32>
    %12 = arith.addf %6, %11 : vector<80x8xf32>
    %c0_12 = arith.constant 0 : index
    %c2 = arith.constant 2 : index
    %c0_13 = arith.constant 0 : index
    %13 = vector.load %arg2[%c0_12, %c2, %c0_13] : memref<1x104x8xbf16, #tpu.memory_space<vmem>>, vector<1x80x8xbf16>
    %14 = vector.shape_cast %13 : vector<1x80x8xbf16> to vector<80x8xbf16>
    %c2_14 = arith.constant 2 : index
    %c0_15 = arith.constant 0 : index
    %c0_16 = arith.constant 0 : index
    %15 = vector.load %arg3[%c2_14, %c0_15, %c0_16] : memref<9x8x8xbf16, #tpu.memory_space<vmem>>, vector<1x8x8xbf16>
    %16 = vector.shape_cast %15 : vector<1x8x8xbf16> to vector<8x8xbf16>
    %cst_17 = arith.constant dense<0.000000e+00> : vector<80x8xf32>
    %17 = tpu.matmul %14, %16, %cst_17 {dimension_numbers = #tpu.dot_dimension_numbers<[1], [0], [0], [1], [0, 0, 1, 1], [], []>} : vector<80x8xbf16>, vector<8x8xbf16>, vector<80x8xf32> -> vector<80x8xf32>
    %18 = arith.addf %12, %17 : vector<80x8xf32>
    %c0_18 = arith.constant 0 : index
    %c10 = arith.constant 10 : index
    %c0_19 = arith.constant 0 : index
    %19 = vector.load %arg2[%c0_18, %c10, %c0_19] : memref<1x104x8xbf16, #tpu.memory_space<vmem>>, vector<1x80x8xbf16>
    %20 = vector.shape_cast %19 : vector<1x80x8xbf16> to vector<80x8xbf16>
    %c3 = arith.constant 3 : index
    %c0_20 = arith.constant 0 : index
    %c0_21 = arith.constant 0 : index
    %21 = vector.load %arg3[%c3, %c0_20, %c0_21] : memref<9x8x8xbf16, #tpu.memory_space<vmem>>, vector<1x8x8xbf16>
    %22 = vector.shape_cast %21 : vector<1x8x8xbf16> to vector<8x8xbf16>
    %cst_22 = arith.constant dense<0.000000e+00> : vector<80x8xf32>
    %23 = tpu.matmul %20, %22, %cst_22 {dimension_numbers = #tpu.dot_dimension_numbers<[1], [0], [0], [1], [0, 0, 1, 1], [], []>} : vector<80x8xbf16>, vector<8x8xbf16>, vector<80x8xf32> -> vector<80x8xf32>
    %24 = arith.addf %18, %23 : vector<80x8xf32>
    %c0_23 = arith.constant 0 : index
    %c11 = arith.constant 11 : index
    %c0_24 = arith.constant 0 : index
    %25 = vector.load %arg2[%c0_23, %c11, %c0_24] : memref<1x104x8xbf16, #tpu.memory_space<vmem>>, vector<1x80x8xbf16>
    %26 = vector.shape_cast %25 : vector<1x80x8xbf16> to vector<80x8xbf16>
    %c4 = arith.constant 4 : index
    %c0_25 = arith.constant 0 : index
    %c0_26 = arith.constant 0 : index
    %27 = vector.load %arg3[%c4, %c0_25, %c0_26] : memref<9x8x8xbf16, #tpu.memory_space<vmem>>, vector<1x8x8xbf16>
    %28 = vector.shape_cast %27 : vector<1x8x8xbf16> to vector<8x8xbf16>
    %cst_27 = arith.constant dense<0.000000e+00> : vector<80x8xf32>
    %29 = tpu.matmul %26, %28, %cst_27 {dimension_numbers = #tpu.dot_dimension_numbers<[1], [0], [0], [1], [0, 0, 1, 1], [], []>} : vector<80x8xbf16>, vector<8x8xbf16>, vector<80x8xf32> -> vector<80x8xf32>
    %30 = arith.addf %24, %29 : vector<80x8xf32>
    %c0_28 = arith.constant 0 : index
    %c12 = arith.constant 12 : index
    %c0_29 = arith.constant 0 : index
    %31 = vector.load %arg2[%c0_28, %c12, %c0_29] : memref<1x104x8xbf16, #tpu.memory_space<vmem>>, vector<1x80x8xbf16>
    %32 = vector.shape_cast %31 : vector<1x80x8xbf16> to vector<80x8xbf16>
    %c5 = arith.constant 5 : index
    %c0_30 = arith.constant 0 : index
    %c0_31 = arith.constant 0 : index
    %33 = vector.load %arg3[%c5, %c0_30, %c0_31] : memref<9x8x8xbf16, #tpu.memory_space<vmem>>, vector<1x8x8xbf16>
    %34 = vector.shape_cast %33 : vector<1x8x8xbf16> to vector<8x8xbf16>
    %cst_32 = arith.constant dense<0.000000e+00> : vector<80x8xf32>
    %35 = tpu.matmul %32, %34, %cst_32 {dimension_numbers = #tpu.dot_dimension_numbers<[1], [0], [0], [1], [0, 0, 1, 1], [], []>} : vector<80x8xbf16>, vector<8x8xbf16>, vector<80x8xf32> -> vector<80x8xf32>
    %36 = arith.addf %30, %35 : vector<80x8xf32>
    %c0_33 = arith.constant 0 : index
    %c20 = arith.constant 20 : index
    %c0_34 = arith.constant 0 : index
    %37 = vector.load %arg2[%c0_33, %c20, %c0_34] : memref<1x104x8xbf16, #tpu.memory_space<vmem>>, vector<1x80x8xbf16>
    %38 = vector.shape_cast %37 : vector<1x80x8xbf16> to vector<80x8xbf16>
    %c6 = arith.constant 6 : index
    %c0_35 = arith.constant 0 : index
    %c0_36 = arith.constant 0 : index
    %39 = vector.load %arg3[%c6, %c0_35, %c0_36] : memref<9x8x8xbf16, #tpu.memory_space<vmem>>, vector<1x8x8xbf16>
    %40 = vector.shape_cast %39 : vector<1x8x8xbf16> to vector<8x8xbf16>
    %cst_37 = arith.constant dense<0.000000e+00> : vector<80x8xf32>
    %41 = tpu.matmul %38, %40, %cst_37 {dimension_numbers = #tpu.dot_dimension_numbers<[1], [0], [0], [1], [0, 0, 1, 1], [], []>} : vector<80x8xbf16>, vector<8x8xbf16>, vector<80x8xf32> -> vector<80x8xf32>
    %42 = arith.addf %36, %41 : vector<80x8xf32>
    %c0_38 = arith.constant 0 : index
    %c21 = arith.constant 21 : index
    %c0_39 = arith.constant 0 : index
    %43 = vector.load %arg2[%c0_38, %c21, %c0_39] : memref<1x104x8xbf16, #tpu.memory_space<vmem>>, vector<1x80x8xbf16>
    %44 = vector.shape_cast %43 : vector<1x80x8xbf16> to vector<80x8xbf16>
    %c7 = arith.constant 7 : index
    %c0_40 = arith.constant 0 : index
    %c0_41 = arith.constant 0 : index
    %45 = vector.load %arg3[%c7, %c0_40, %c0_41] : memref<9x8x8xbf16, #tpu.memory_space<vmem>>, vector<1x8x8xbf16>
    %46 = vector.shape_cast %45 : vector<1x8x8xbf16> to vector<8x8xbf16>
    %cst_42 = arith.constant dense<0.000000e+00> : vector<80x8xf32>
    %47 = tpu.matmul %44, %46, %cst_42 {dimension_numbers = #tpu.dot_dimension_numbers<[1], [0], [0], [1], [0, 0, 1, 1], [], []>} : vector<80x8xbf16>, vector<8x8xbf16>, vector<80x8xf32> -> vector<80x8xf32>
    %48 = arith.addf %42, %47 : vector<80x8xf32>
    %c0_43 = arith.constant 0 : index
    %c22 = arith.constant 22 : index
    %c0_44 = arith.constant 0 : index
    %49 = vector.load %arg2[%c0_43, %c22, %c0_44] : memref<1x104x8xbf16, #tpu.memory_space<vmem>>, vector<1x80x8xbf16>
    %50 = vector.shape_cast %49 : vector<1x80x8xbf16> to vector<80x8xbf16>
    %c8 = arith.constant 8 : index
    %c0_45 = arith.constant 0 : index
    %c0_46 = arith.constant 0 : index
    %51 = vector.load %arg3[%c8, %c0_45, %c0_46] : memref<9x8x8xbf16, #tpu.memory_space<vmem>>, vector<1x8x8xbf16>
    %52 = vector.shape_cast %51 : vector<1x8x8xbf16> to vector<8x8xbf16>
    %cst_47 = arith.constant dense<0.000000e+00> : vector<80x8xf32>
    %53 = tpu.matmul %50, %52, %cst_47 {dimension_numbers = #tpu.dot_dimension_numbers<[1], [0], [0], [1], [0, 0, 1, 1], [], []>} : vector<80x8xbf16>, vector<8x8xbf16>, vector<80x8xf32> -> vector<80x8xf32>
    %54 = arith.addf %48, %53 : vector<80x8xf32>
    %cst_48 = arith.constant 0.000000e+00 : f32
    %55 = vector.broadcast %cst_48 : f32 to vector<80x8xf32>
    %56 = arith.cmpf oge, %54, %55 : vector<80x8xf32>
    %cst_49 = arith.constant 2.000000e-01 : f32
    %57 = vector.broadcast %cst_49 : f32 to vector<80x8xf32>
    %58 = arith.mulf %57, %54 : vector<80x8xf32>
    %59 = arith.select %56, %54, %58 : vector<80x8xi1>, vector<80x8xf32>
    %c0_50 = arith.constant 0 : index
    %c0_51 = arith.constant 0 : index
    %c0_52 = arith.constant 0 : index
    %60 = vector.load %arg4[%c0_50, %c0_51, %c0_52] : memref<1x80x4xbf16, #tpu.memory_space<vmem>>, vector<1x80x4xbf16>
    %61 = vector.shape_cast %60 : vector<1x80x4xbf16> to vector<80x4xbf16>
    %c0_53 = arith.constant 0 : index
    %c0_54 = arith.constant 0 : index
    %62 = vector.load %arg5[%c0_53, %c0_54] : memref<4x8xbf16, #tpu.memory_space<vmem>>, vector<4x8xbf16>
    %cst_55 = arith.constant dense<0.000000e+00> : vector<80x8xf32>
    %63 = tpu.matmul %61, %62, %cst_55 {dimension_numbers = #tpu.dot_dimension_numbers<[1], [0], [0], [1], [0, 0, 1, 1], [], []>} : vector<80x4xbf16>, vector<4x8xbf16>, vector<80x8xf32> -> vector<80x8xf32>
    %c0_56 = arith.constant 0 : index
    %c0_57 = arith.constant 0 : index
    %64 = vector.load %arg6[%c0_56, %c0_57] : memref<1x8xf32, #tpu.memory_space<vmem>>, vector<1x8xf32>
    %65 = vector.broadcast %64 : vector<1x8xf32> to vector<80x8xf32>
    %66 = arith.addf %63, %65 : vector<80x8xf32>
    %c0_58 = arith.constant 0 : index
    %c0_59 = arith.constant 0 : index
    %67 = memref.load %arg7[%c0_58, %c0_59] : memref<1x1xf32, #tpu.memory_space<smem>>
    %68 = vector.broadcast %67 : f32 to vector<80x8xf32>
    %69 = arith.mulf %68, %59 : vector<80x8xf32>
    %70 = arith.addf %66, %69 : vector<80x8xf32>
    %c0_60 = arith.constant 0 : index
    %c0_61 = arith.constant 0 : index
    %c0_62 = arith.constant 0 : index
    %71 = vector.load %arg8[%c0_60, %c0_61, %c0_62] : memref<1x80x8xf32, #tpu.memory_space<vmem>>, vector<1x80x8xf32>
    %72 = vector.shape_cast %71 : vector<1x80x8xf32> to vector<80x8xf32>
    %73 = vector.shape_cast %70 : vector<80x8xf32> to vector<1x80x8xf32>
    tpu.vector_store %arg8[%c0_60, %c0_61, %c0_62], %73 {strides = array<i32>} : memref<1x80x8xf32, #tpu.memory_space<vmem>>, vector<1x80x8xf32>,
    return
  }
  func.func @transform_0(%arg0: i32, %arg1: i32) -> (i32, i32, i32) {
    %c0_i32 = arith.constant 0 : i32
    %c0_i32_0 = arith.constant 0 : i32
    %c0_i32_1 = arith.constant 0 : i32
    return %arg0, %c0_i32, %c0_i32_0 : i32, i32, i32
  }
  func.func @transform_1(%arg0: i32, %arg1: i32) -> (i32, i32, i32) {
    %c0_i32 = arith.constant 0 : i32
    %c0_i32_0 = arith.constant 0 : i32
    %c0_i32_1 = arith.constant 0 : i32
    return %c0_i32, %c0_i32_0, %arg1 : i32, i32, i32
  }
  func.func @transform_2(%arg0: i32, %arg1: i32) -> (i32, i32, i32) {
    %c0_i32 = arith.constant 0 : i32
    %c0_i32_0 = arith.constant 0 : i32
    %c0_i32_1 = arith.constant 0 : i32
    return %arg0, %c0_i32, %c0_i32_0 : i32, i32, i32
  }
  func.func @transform_3(%arg0: i32, %arg1: i32) -> (i32, i32) {
    %c0_i32 = arith.constant 0 : i32
    %c0_i32_0 = arith.constant 0 : i32
    return %c0_i32, %arg1 : i32, i32
  }
  func.func @transform_4(%arg0: i32, %arg1: i32) -> (i32, i32) {
    %c0_i32 = arith.constant 0 : i32
    %c0_i32_0 = arith.constant 0 : i32
    return %c0_i32, %arg1 : i32, i32
  }
  func.func @transform_5(%arg0: i32, %arg1: i32) -> (i32, i32) {
    %c0_i32 = arith.constant 0 : i32
    %c0_i32_0 = arith.constant 0 : i32
    %c0_i32_1 = arith.constant 0 : i32
    return %c0_i32, %c0_i32_0 : i32, i32
  }
  func.func @transform_6(%arg0: i32, %arg1: i32) -> (i32, i32, i32) {
    %c0_i32 = arith.constant 0 : i32
    %c0_i32_0 = arith.constant 0 : i32
    return %arg0, %c0_i32, %arg1 : i32, i32, i32
  }
}

</mosaic_0001>

<bundles_post_ra>
// kernel: d_block_forward.2
= control target key start
LH: loop header
LB: loop body
LE: loop exit
PB: predicated region body
PF: predicated region fallthrough
CT: control target
= control target key end

     0   :  { %s1227_s9 = smov 0   ;;  %s1229_s10 = smov 0   ;;  %s1431_s0 = inlined_call_operand.vmem [shape: bf16[2,88,16], index: 0, kind: input, shape index: {}]   ;;  %s1432_s1 = inlined_call_operand.vmem [shape: bf16[4,16,8], index: 1, kind: input, shape index: {}]   ;;  %s1433_s2 = inlined_call_operand.vmem [shape: bf16[2,72,8], index: 2, kind: output, shape index: {}]  }
   0x1   :  { %s1231_s11 = smov 0  }
   0x2 LB: > { %s24_s12 = sadd.s32 1, %s1204_s10  ;;  %p916_p0 = scmp.ge.s32.totalorder %s1208_s11, 1  ;;  %s1208_s11 = sphi %s1231_s11, %s12_s11   ;;  %s1204_s10 = sphi %s1229_s10, %s1435_s10   ;;  %s1200_s9 = sphi %s1227_s9, %s1434_s9  }
   0x3   : > { %p26_p1 = scmp.ge.s32.totalorder %s24_s12, 2  ;;  %p135_p2 = scmp.lt.s32.totalorder %s1208_s11, 3 }
   0x5   : > { %s1437_s12 = smov (%p26_p1, %s24_s12), 0  ;;  %p136_p3 = pnand %p916_p0, %p135_p2 }
   0x6   : > { %v1170_v0 = vld [vmem:[%s1432_s1 + $0x8] sm:$0xff] (!%p136_p3)   ;;  %v1210_v1 = vmov (!%p136_p3), 0.0   ;;  %v1171_v2 = vld [vmem:[%s1432_s1 + $0x10] sm:$0xff] (!%p136_p3)   ;;  %vm1211_vm0 = vmmov (!%p136_p3), 0   ;;  %p164_p4 = scmp.lt.s32.totalorder (!%p136_p3), %s1200_s9, 1  ;;  %vm268_vm2 = vcmask (!%p136_p3), 130048  }
   0x7   : > { %139 = sbr.rel (%p136_p3) target bundleno = 321 (0x141), region = 28  ;;  %1005 = vmatprep.subr.bf16.mxu1 (!%p136_p3), %v1210_v1  ;;  %1049 = vmatprep.subr.bf16.mxu0 (!%p136_p3), %v1210_v1  ;;  %vm222_vm1 = vsmask.f32 (!%p136_p3), 7424  ;;  %v1174_v17 = vld [vmem:[%s1432_s1] sm:$0xff] (!%p136_p3)   ;;  %v1177_v27 = vld [vmem:[%s1432_s1 + $0x18] sm:$0xff] (!%p136_p3)   ;;  %vm632_vm3 = vcmask (!%p136_p3), 1046528  }
   0x8   : > { %1006 = vmatpush3.bf16.msra.mxu1 (!%p136_p3), %v1170_v0  ;;  %1007 = vmatprep.mubr.msk.bf16.mxu1 (!%p136_p3), %vm1211_vm0, %v1210_v1  ;;  %vm808_vm5 = vcmask (!%p136_p3), 60416  }
   0x9   : > { %1050 = vmatpush3.bf16.msra.mxu0 (!%p136_p3), %v1171_v2  ;;  %1027 = vmatprep.subr.bf16.mxu1 (!%p136_p3), %v1210_v1 }
   0xa   : > { %1051 = vmatprep.mubr.msk.bf16.mxu0 (!%p136_p3), %vm1211_vm0, %v1210_v1  ;;  %1071 = vmatprep.subr.bf16.mxu0 (!%p136_p3), %v1210_v1 }
   0xe   : > { %s1439_s9 = smov (!%p164_p4, %s1200_s9), 1 }
   0xf   : > { %s1142_s17 = smul.u32 44, %s1439_s9 }
  0x10   : > { %s1143_s25 = smul.u32 36, %s1439_s9 }
  0x11   : > { %s1265_s20 = scalar_lea.vmem %s1431_s0, %s1142_s17 }
  0x12   : > { %v1268_v3 = vld [vmem:[%s1265_s20] sm:$0xff]   ;;  %v1271_v4 = vld [vmem:[%s1265_s20 + $0x8] sm:$0xff]   ;;  %v1285_v12 = vld [vmem:[%s1265_s20 + $0x10] sm:$0xff]   ;;  %s1402_s28 = scalar_lea.vmem %s1433_s2, %s1143_s25 }
  0x13   : > { %v446_v5 = vld [vmem:[%s1265_s20 + $0x4] sm:$0xf]  ;;  %v1275_v6 = vld [vmem:[%s1265_s20 + $0x8] sm:$0xf]  ;;  %v224_v7 = vshrl.u32 %v1268_v3, 16  ;;  %v226_v8 = vshll.u32 %v1268_v3, 16 }
  0x14   : > { %v231_v9 = vshll.u32 %v1271_v4, 16  ;;  %v941_v10 = vcombine.low %v446_v5, %v1275_v6  ;;  %v1282_v11 = vld [vmem:[%s1265_s20 + $0xc] sm:$0xff]   ;;  %v235_v19 = vshrl.u32 %v1271_v4, 16  ;;  %v1293_v20 = vld [vmem:[%s1265_s20 + $0x14] sm:$0xff]   ;;  %v239_v23 = vshll.u32 %v1285_v12, 16  ;;  %v1313_v36 = vld [vmem:[%s1265_s20 + $0x1c] sm:$0xff]  }
  0x15   : > { %v228_v13 = vrot.slane %v226_v8, 1  ;;  %v492_v18 = vshll.u32 %v1282_v11, 16  ;;  %v496_v28 = vshrl.u32 %v1282_v11, 16  ;;  %v500_v29 = vshll.u32 %v1293_v20, 16  ;;  %v1307_v33 = vld [vmem:[%s1265_s20 + $0x18] sm:$0xff]  }
  0x16   : > { %v233_v14 = vrot.slane %v231_v9, 1  ;;  %v485_v15 = vshrl.u32 %v941_v10, 16  ;;  %v487_v16 = vshll.u32 %v941_v10, 16  ;;  %v241_v32 = vrot.slane %v239_v23, 1  ;;  %v1319_v40 = vld [vmem:[%s1265_s20 + $0x20] sm:$0xf] }
  0x17   : > { %v229_v21 = vor.u32 %v228_v13, %v224_v7  ;;  %v494_v24 = vrot.slane %v492_v18, 1  ;;  %v502_v35 = vrot.slane %v500_v29, 1  ;;  %v243_v38 = vshrl.u32 %v1285_v12, 16  ;;  %v193_v41 = vld [vmem:[%s1265_s20 + $0x24] sm:$0x1] }
  0x18   : > { %v489_v22 = vrot.slane %v487_v16, 1  ;;  %v237_v31 = vor.u32 %v235_v19, %v233_v14  ;;  %v247_v39 = vshll.u32 %v1307_v33, 16  ;;  %v504_v43 = vshrl.u32 %v1293_v20, 16  ;;  %v1183_v50 = vld [vmem:[%s1265_s20 + $0x24] sm:$0x1f]  }
  0x19   : > { %v234_v25 = vsel %vm222_vm1, %v229_v21, %v233_v14  ;;  %v498_v34 = vor.u32 %v496_v28, %v494_v24  ;;  %v508_v44 = vshll.u32 %v1313_v36, 16  ;;  %v245_v45 = vor.u32 %v243_v38, %v241_v32  ;;  %v625_v5 = vld [vmem:[%s1265_s20 + $0x4] sm:$0xe] }
  0x1a   : > { %v490_v26 = vor.u32 %v489_v22, %v485_v15  ;;  %1008 = vmatmul.mubr.msk.bf16.vlgmr.msra.gmra.mrb[0].mxu1 %vm268_vm2, %v234_v25  ;;  %v242_v37 = vsel %vm222_vm1, %v237_v31, %v241_v32  ;;  %v249_v46 = vrot.slane %v247_v39, 1  ;;  %v925_v47 = vcombine.low %v1319_v40, %v193_v41 }
  0x1b   : > { %1028 = vmatpush3.bf16.msra.mxu1 %v1174_v17  ;;  %1011 = vmatprep.mubr.msk.bf16.mxu1 %vm1211_vm0, %v1210_v1  ;;  %v503_v42 = vsel %vm222_vm1, %v498_v34, %v502_v35  ;;  %v506_v48 = vor.u32 %v504_v43, %v502_v35  ;;  %v510_v49 = vrot.slane %v508_v44, 1  ;;  %v251_v52 = vshrl.u32 %v1307_v33, 16 }
  0x1c   : > { %v495_v30 = vsel %vm222_vm1, %v490_v26, %v494_v24  ;;  %v250_v51 = vsel %vm222_vm1, %v245_v45, %v249_v46  ;;  %v255_v53 = vshll.u32 %v925_v47, 16  ;;  %v512_v55 = vshrl.u32 %v1313_v36, 16 }
  0x1d   : > { %1052 = vmatmul.mubr.msk.bf16.vlgmr.msra.gmra.mrb[0].mxu0 %vm268_vm2, %v495_v30  ;;  %v511_v54 = vsel %vm222_vm1, %v506_v48, %v510_v49  ;;  %v516_v56 = vshll.u32 %v1183_v50, 16  ;;  %v253_v57 = vor.u32 %v251_v52, %v249_v46  ;;  %v259_v63 = vshrl.u32 %v925_v47, 16 }
  0x1e   : > { %1072 = vmatpush3.bf16.msra.mxu0 %v1177_v27  ;;  %1055 = vmatprep.mubr.msk.bf16.mxu0 %vm1211_vm0, %v1210_v1  ;;  %v257_v58 = vrot.slane %v255_v53, 1  ;;  %v514_v59 = vor.u32 %v512_v55, %v510_v49  ;;  %v520_v0 = vshrl.u32 %v1183_v50, 16  ;;  %v954_v8 = vcombine.low %v625_v5, %v1275_v6 }
  0x1f   : > { %v518_v60 = vrot.slane %v516_v56, 1  ;;  %v634_v10 = vrot.slane %v1282_v11, 1  ;;  %v636_v6 = vrot.slane %v1293_v20, 1 }
  0x20   : > { %v258_v61 = vsel %vm222_vm1, %v253_v57, %v257_v58  ;;  %v261_v2 = vor.u32 %v259_v63, %v257_v58  ;;  %v633_v9 = vrot.slane %v954_v8, 1 }
  0x21   : > { %v519_v62 = vsel %vm222_vm1, %v514_v59, %v518_v60  ;;  %v522_v7 = vor.u32 %v520_v0, %v518_v60  ;;  %v637_v14 = vsel %vm632_vm3, %v634_v10, %v636_v6 }
  0x22   : > { %1012 = vmatmul.mubr.msk.bf16.gmra.mrb[4].mxu1 %vm268_vm2, %v242_v37  ;;  %v635_v13 = vsel %vm632_vm3, %v633_v9, %v634_v10 }
  0x23   : > { %1015 = vmatprep.mubr.msk.bf16.mxu1 %vm1211_vm0, %v1210_v1 }
  0x25   : > { %1056 = vmatmul.mubr.msk.bf16.gmra.mrb[4].mxu0 %vm268_vm2, %v503_v42 }
  0x26   : > { %1059 = vmatprep.mubr.msk.bf16.mxu0 %vm1211_vm0, %v1210_v1 }
  0x2a   : > { %1016 = vmatmul.mubr.msk.bf16.gmra.mrb[8].mxu1 %vm268_vm2, %v250_v51 }
  0x2b   : > { %1019 = vmatprep.mubr.msk.bf16.mxu1 %vm1211_vm0, %v1210_v1 }
  0x2d   : > { %1060 = vmatmul.mubr.msk.bf16.gmra.mrb[8].mxu0 %vm268_vm2, %v511_v54 }
  0x2e   : > { %1063 = vmatprep.mubr.msk.bf16.mxu0 %vm1211_vm0, %v1210_v1 }
  0x32   : > { %1020 = vmatmul.mubr.msk.bf16.gmra.mrb[12].mxu1 %vm268_vm2, %v258_v61 }
  0x33   : > { %1023 = vmatprep.mubr.msk.bf16.mxu1 %vm1211_vm0, %v1210_v1 }
  0x35   : > { %1064 = vmatmul.mubr.msk.bf16.gmra.mrb[12].mxu0 %vm268_vm2, %v519_v62 }
  0x36   : > { %1067 = vmatprep.mubr.msk.bf16.mxu0 %vm1211_vm0, %v1210_v1 }
  0x3a   : > { %1024 = vmatmul.mubr.msk.bf16.gmra.mrb[16].mxu1 %vm268_vm2, %v261_v2 }
  0x3b   : > { %1029 = vmatprep.mubr.msk.bf16.mxu1 %vm1211_vm0, %v1210_v1 }
  0x3d   : > { %1068 = vmatmul.mubr.msk.bf16.gmra.mrb[16].mxu0 %vm268_vm2, %v522_v7 }
  0x3e   : > { %1073 = vmatprep.mubr.msk.bf16.mxu0 %vm1211_vm0, %v1210_v1 }
  0x42   : > { %1030 = vmatmul.mubr.msk.bf16.vlgmr.msra.gmra.mrb[0].mxu1 %vm268_vm2, %v1268_v3  ;;  %v638_v3 = vrot.slane %v1313_v36, 1 }
  0x43   : > { %1033 = vmatprep.mubr.msk.bf16.mxu1 %vm1211_vm0, %v1210_v1 }
  0x44   : > { %v639_v11 = vsel %vm632_vm3, %v636_v6, %v638_v3 }
  0x45   : > { %1074 = vmatmul.mubr.msk.bf16.vlgmr.msra.gmra.mrb[0].mxu0 %vm268_vm2, %v635_v13 }
  0x46   : > { %1077 = vmatprep.mubr.msk.bf16.mxu0 %vm1211_vm0, %v1210_v1 }
  0x4a   : > { %1034 = vmatmul.mubr.msk.bf16.gmra.mrb[4].mxu1 %vm268_vm2, %v1271_v4  ;;  %v640_v4 = vrot.slane %v1183_v50, 1 }
  0x4b   : > { %1037 = vmatprep.mubr.msk.bf16.mxu1 %vm1211_vm0, %v1210_v1 }
  0x4c   : > { %v641_v15 = vsel %vm632_vm3, %v638_v3, %v640_v4 }
  0x4d   : > { %1078 = vmatmul.mubr.msk.bf16.gmra.mrb[4].mxu0 %vm268_vm2, %v637_v14 }
  0x4e   : > { %1081 = vmatprep.mubr.msk.bf16.mxu0 %vm1211_vm0, %v1210_v1 }
  0x52   : > { %1038 = vmatmul.mubr.msk.bf16.gmra.mrb[8].mxu1 %vm268_vm2, %v1285_v12  ;;  %v932_v12 = vcombine.low %v1319_v40, %v1319_v40 }
  0x53   : > { %1041 = vmatprep.mubr.msk.bf16.mxu1 %vm1211_vm0, %v1210_v1 }
  0x55   : > { %1082 = vmatmul.mubr.msk.bf16.gmra.mrb[8].mxu0 %vm268_vm2, %v639_v11 }
  0x56   : > { %1085 = vmatprep.mubr.msk.bf16.mxu0 %vm1211_vm0, %v1210_v1 }
  0x5a   : > { %1042 = vmatmul.mubr.msk.bf16.gmra.mrb[12].mxu1 %vm268_vm2, %v1307_v33 }
  0x5b   : > { %1045 = vmatprep.mubr.msk.bf16.mxu1 %vm1211_vm0, %v1210_v1 }
  0x5d   : > { %1086 = vmatmul.mubr.msk.bf16.gmra.mrb[12].mxu0 %vm268_vm2, %v641_v15 }
  0x5e   : > { %1089 = vmatprep.mubr.msk.bf16.mxu0 %vm1211_vm0, %v1210_v1 }
  0x62   : > { %1046 = vmatmul.mubr.msk.bf16.gmra.mrb[16].mxu1 %vm268_vm2, %v932_v12 }
  0x65   : > { %1090 = vmatmul.mubr.msk.bf16.gmra.mrb[16].mxu0 %vm268_vm2, %v640_v4 }
 0x115   : > { %v408_v16 = vpop.f32.mrb[0].mxu1 }
 0x116   : > { %v1031_v17 = vpop.f32.mrb[1].mxu1 }
 0x117   : > { %v411_v19 = vpop.f32.mrb[2].mxu1 }
 0x118   : > { %v697_v18 = vpop.f32.mrb[0].mxu0  ;;  %v1032_v22 = vpop.f32.mrb[3].mxu1 }
 0x119   : > { %v1093_v20 = vadd.f32 %v697_v18, %v408_v16  ;;  %v1075_v21 = vpop.f32.mrb[1].mxu0 }
 0x11a   : > { %v700_v23 = vpop.f32.mrb[2].mxu0 }
 0x11b   : > { %vm744_vm4 = vcmp.ge.f32.partialorder %v1093_v20, 0.0  ;;  %v753_v24 = vmul.f32 0.2, %v1093_v20  ;;  %v1094_v25 = vadd.f32 %v700_v23, %v411_v19  ;;  %v1076_v1 = vpop.f32.mrb[3].mxu0 }
 0x11d   : > { %v762_v26 = vsel %vm744_vm4, %v1093_v20, %v753_v24  ;;  %vm745_vm6 = vcmp.ge.f32.partialorder %v1094_v25, 0.0  ;;  %v754_v27 = vmul.f32 0.2, %v1094_v25  ;;  %v416_v29 = vpop.f32.mrb[4].mxu1 }
 0x11e   : > { %v972_v28 = vpack.c.bf16 %v762_v26, %v762_v26  ;;  %v1035_v31 = vpop.f32.mrb[5].mxu1 }
 0x11f   : > { %v763_v30 = vsel %vm745_vm6, %v1094_v25, %v754_v27  ;;  %v419_v34 = vpop.f32.mrb[6].mxu1 }
 0x120   : > { %809 = vst.msk [vmem:[%s1402_s28] sm:$0xf] %vm808_vm5, %v972_v28  ;;  %v973_v32 = vpack.c.bf16 %v763_v30, %v763_v30  ;;  %v705_v33 = vpop.f32.mrb[4].mxu0  ;;  %v1036_v37 = vpop.f32.mrb[7].mxu1 }
 0x121   : > { %v1095_v35 = vadd.f32 %v705_v33, %v416_v29  ;;  %v1079_v36 = vpop.f32.mrb[5].mxu0 }
 0x122   : > { %810 = vst.msk [vmem:[%s1402_s28 + $0x4] sm:$0xf] %vm808_vm5, %v973_v32  ;;  %v708_v38 = vpop.f32.mrb[6].mxu0 }
 0x123   : > { %vm746_vm7 = vcmp.ge.f32.partialorder %v1095_v35, 0.0  ;;  %v755_v39 = vmul.f32 0.2, %v1095_v35  ;;  %v1096_v40 = vadd.f32 %v708_v38, %v419_v34  ;;  %v1080_v41 = vpop.f32.mrb[7].mxu0 }
 0x125   : > { %v764_v42 = vsel %vm746_vm7, %v1095_v35, %v755_v39  ;;  %vm747_vm8 = vcmp.ge.f32.partialorder %v1096_v40, 0.0  ;;  %v756_v43 = vmul.f32 0.2, %v1096_v40  ;;  %v424_v45 = vpop.f32.mrb[8].mxu1 }
 0x126   : > { %v974_v44 = vpack.c.bf16 %v764_v42, %v764_v42  ;;  %v1039_v47 = vpop.f32.mrb[9].mxu1 }
 0x127   : > { %v765_v46 = vsel %vm747_vm8, %v1096_v40, %v756_v43  ;;  %v427_v50 = vpop.f32.mrb[10].mxu1 }
 0x128   : > { %811 = vst.msk [vmem:[%s1402_s28 + $0x8] sm:$0xf] %vm808_vm5, %v974_v44  ;;  %v975_v48 = vpack.c.bf16 %v765_v46, %v765_v46  ;;  %v713_v49 = vpop.f32.mrb[8].mxu0  ;;  %v1040_v53 = vpop.f32.mrb[11].mxu1 }
 0x129   : > { %v1097_v51 = vadd.f32 %v713_v49, %v424_v45  ;;  %v1083_v52 = vpop.f32.mrb[9].mxu0 }
 0x12a   : > { %812 = vst.msk [vmem:[%s1402_s28 + $0xc] sm:$0xf] %vm808_vm5, %v975_v48  ;;  %v716_v54 = vpop.f32.mrb[10].mxu0 }
 0x12b   : > { %vm748_vm9 = vcmp.ge.f32.partialorder %v1097_v51, 0.0  ;;  %v757_v55 = vmul.f32 0.2, %v1097_v51  ;;  %v1098_v56 = vadd.f32 %v716_v54, %v427_v50  ;;  %v1084_v57 = vpop.f32.mrb[11].mxu0 }
 0x12d   : > { %v766_v58 = vsel %vm748_vm9, %v1097_v51, %v757_v55  ;;  %vm749_vm10 = vcmp.ge.f32.partialorder %v1098_v56, 0.0  ;;  %v758_v59 = vmul.f32 0.2, %v1098_v56  ;;  %v432_v61 = vpop.f32.mrb[12].mxu1 }
 0x12e   : > { %v976_v60 = vpack.c.bf16 %v766_v58, %v766_v58  ;;  %v1043_v63 = vpop.f32.mrb[13].mxu1 }
 0x12f   : > { %v767_v62 = vsel %vm749_vm10, %v1098_v56, %v758_v59  ;;  %v435_v5 = vpop.f32.mrb[14].mxu1 }
 0x130   : > { %813 = vst.msk [vmem:[%s1402_s28 + $0x10] sm:$0xf] %vm808_vm5, %v976_v60  ;;  %v977_v0 = vpack.c.bf16 %v767_v62, %v767_v62  ;;  %v721_v2 = vpop.f32.mrb[12].mxu0  ;;  %v1044_v9 = vpop.f32.mrb[15].mxu1 }
 0x131   : > { %v1099_v7 = vadd.f32 %v721_v2, %v432_v61  ;;  %v1087_v8 = vpop.f32.mrb[13].mxu0 }
 0x132   : > { %814 = vst.msk [vmem:[%s1402_s28 + $0x14] sm:$0xf] %vm808_vm5, %v977_v0  ;;  %v724_v10 = vpop.f32.mrb[14].mxu0 }
 0x133   : > { %vm750_vm11 = vcmp.ge.f32.partialorder %v1099_v7, 0.0  ;;  %v759_v13 = vmul.f32 0.2, %v1099_v7  ;;  %v1100_v6 = vadd.f32 %v724_v10, %v435_v5  ;;  %v1088_v14 = vpop.f32.mrb[15].mxu0 }
 0x135   : > { %v768_v3 = vsel %vm750_vm11, %v1099_v7, %v759_v13  ;;  %vm751_vm12 = vcmp.ge.f32.partialorder %v1100_v6, 0.0  ;;  %v760_v11 = vmul.f32 0.2, %v1100_v6  ;;  %v440_v15 = vpop.f32.mrb[16].mxu1 }
 0x136   : > { %v978_v4 = vpack.c.bf16 %v768_v3, %v768_v3  ;;  %v1047_v16 = vpop.f32.mrb[17].mxu1 }
 0x137   : > { %v769_v12 = vsel %vm751_vm12, %v1100_v6, %v760_v11  ;;  %v443_v19 = vpop.f32.mrb[18].mxu1 }
 0x138   : > { %815 = vst.msk [vmem:[%s1402_s28 + $0x18] sm:$0xf] %vm808_vm5, %v978_v4  ;;  %v979_v17 = vpack.c.bf16 %v769_v12, %v769_v12  ;;  %v729_v18 = vpop.f32.mrb[16].mxu0  ;;  %v1048_v22 = vpop.f32.mrb[19].mxu1 }
 0x139   : > { %v1101_v20 = vadd.f32 %v729_v18, %v440_v15  ;;  %v1091_v21 = vpop.f32.mrb[17].mxu0 }
 0x13a   : > { %816 = vst.msk [vmem:[%s1402_s28 + $0x1c] sm:$0xf] %vm808_vm5, %v979_v17  ;;  %v732_v23 = vpop.f32.mrb[18].mxu0 }
 0x13b   : > { %vm752_vm13 = vcmp.ge.f32.partialorder %v1101_v20, 0.0  ;;  %v761_v24 = vmul.f32 0.2, %v1101_v20  ;;  %v1092_v25 = vpop.f32.mrb[19].mxu0 }
 0x13d   : > { %v770_v1 = vsel %vm752_vm13, %v1101_v20, %v761_v24 }
 0x13e   : > { %v980_v26 = vpack.c.bf16 %v770_v1, %v770_v1 }
 0x140   : > { %817 = vst.msk [vmem:[%s1402_s28 + $0x20] sm:$0xf] %vm808_vm5, %v980_v26 }
 0x141 PF: > { %s12_s11 = sadd.s32 1, %s1208_s11   ;;  %s1434_s9 = smov %s1204_s10 }
 0x142   : > { %p9_p5 = scmp.ge.s32.totalorder %s12_s11, 4   ;;  %s1435_s10 = smov %s1437_s12 }
 0x144   :  { %11 = sbr.rel (!%p9_p5) target bundleno = 2 (0x2), region = 64 }

// kernel: d_block_forward.3
= control target key start
LH: loop header
LB: loop body
LE: loop exit
PB: predicated region body
PF: predicated region fallthrough
CT: control target
= control target key end

     0   :  { %s2574_s23 = smov 0   ;;  %s2576_s24 = smov 0   ;;  %s3117_s0 = inlined_call_operand.vmem [shape: bf16[2,104,8], index: 0, kind: input, shape index: {}]   ;;  %s3118_s1 = inlined_call_operand.vmem [shape: bf16[9,8,8], index: 1, kind: input, shape index: {}]   ;;  %s3119_s2 = inlined_call_operand.vmem [shape: bf16[2,80,4], index: 2, kind: input, shape index: {}]   ;;  %s3120_s3 = inlined_call_operand.vmem [shape: bf16[4,8], index: 3, kind: input, shape index: {}]   ;;  %s3121_s4 = inlined_call_operand.vmem [shape: f32[1,8], index: 4, kind: input, shape index: {}]   ;;  %s3122_s5 = inlined_call_operand.<no memory space> [shape: f32[1,1], index: 5, kind: input, shape index: {}]   ;;  %s3123_s6 = inlined_call_operand.vmem [shape: f32[2,80,8], index: 6, kind: output, shape index: {}]  }
   0x1   :  { %11 = sst [smem:[#allocation2]] %s3122_s5  ;;  %s2578_s25 = smov 0  }
   0x2 LB: > { %s29_s5 = sadd.s32 1, %s2528_s24  ;;  %p1930_p0 = scmp.ge.s32.totalorder %s2532_s25, 1  ;;  %s2532_s25 = sphi %s2578_s25, %s17_s25   ;;  %s2528_s24 = sphi %s2576_s24, %s3125_s24   ;;  %s2524_s23 = sphi %s2574_s23, %s3124_s23  }
   0x3   : > { %p31_p1 = scmp.ge.s32.totalorder %s29_s5, 2  ;;  %p263_p2 = scmp.lt.s32.totalorder %s2532_s25, 3 }
   0x5   : > { %s3127_s5 = smov (%p31_p1, %s29_s5), 0  ;;  %p264_p3 = pnand %p1930_p0, %p263_p2 }
   0x6   : > { %vm445_vm0 = vcmask (!%p264_p3), 1043456   ;;  %v1970_v0 = vld [vmem:[%s3118_s1 + $0x10] sm:$0xf] (!%p264_p3)  ;;  %v1934_v1 = vld [vmem:[%s3118_s1 + $0x4] sm:$0xf] (!%p264_p3)  ;;  %v2534_v2 = vmov (!%p264_p3), 0.0  }
   0x7   : > { %267 = sbr.rel (%p264_p3) target bundleno = 446 (0x1be), region = 44  ;;  %2171 = vmatprep.subr.bf16.mxu0 (!%p264_p3), %v2534_v2  ;;  %2083 = vmatprep.subr.bf16.mxu1 (!%p264_p3), %v2534_v2  ;;  %v956_v3 = vsel (!%p264_p3), %vm445_vm0, %v1970_v0, 0  ;;  %v447_v4 = vsel (!%p264_p3), %vm445_vm0, %v1934_v1, 0  ;;  %p312_p4 = scmp.lt.s32.totalorder (!%p264_p3), %s2524_s23, 1  ;;  %vm2535_vm1 = vmmov (!%p264_p3), 0   ;;  %vm429_vm4 = vcmask (!%p264_p3), 64512  }
   0x8   : > { %2172 = vmatpush3.bf16.msra.mxu0 (!%p264_p3), %v956_v3  ;;  %2084 = vmatpush3.bf16.msra.mxu1 (!%p264_p3), %v447_v4  ;;  %vm384_vm2 = vsmask.f32 (!%p264_p3), 7424  ;;  %vm886_vm3 = vsmask.f32 (!%p264_p3), 6400  ;;  %v352_v16 = vld [vmem:[%s3118_s1] sm:$0xf] (!%p264_p3) }
   0x9   : > { %2085 = vmatprep.mubr.msk.bf16.mxu1 (!%p264_p3), %vm2535_vm1, %v2534_v2  ;;  %2173 = vmatprep.mubr.msk.bf16.mxu0 (!%p264_p3), %vm2535_vm1, %v2534_v2  ;;  %v1977_v24 = vld [vmem:[%s3118_s1 + $0x14] sm:$0xf] (!%p264_p3)  ;;  %v533_v33 = vsel (!%p264_p3), %vm445_vm0, %v352_v16, 0  ;;  %vm614_vm5 = vcmask (!%p264_p3), 1046528   ;;  %vm1047_vm6 = vcmask (!%p264_p3), 1045504   ;;  %vm1480_vm7 = vcmask (!%p264_p3), 1044480  }
   0xa   : > { %2193 = vmatprep.subr.bf16.mxu0 (!%p264_p3), %v2534_v2  ;;  %2105 = vmatprep.subr.bf16.mxu1 (!%p264_p3), %v2534_v2  ;;  %v1075_v41 = vsel (!%p264_p3), %vm445_vm0, %v1977_v24, 0  ;;  %vm1682_vm8 = vcmask (!%p264_p3), 1041408   ;;  %vm1319_vm9 = vsmask.f32 (!%p264_p3), 5376  ;;  %vm1666_vm10 = vcmask (!%p264_p3), 31744  }
   0xe   : > { %s3129_s23 = smov (!%p312_p4, %s2524_s23), 1 }
   0xf   : > { %s2453_s30 = smul.u32 52, %s3129_s23 }
  0x10   : > { %s2454_s16 = smul.u32 40, %s3129_s23 }
  0x11   : > { %s2614_s9 = scalar_lea.vmem %s3117_s0, %s2453_s30  ;;  %s2455_s12 = smul.u32 80, %s3129_s23 }
  0x12   : > { %v342_v5 = vld [vmem:[%s2614_s9] sm:$0xf]  ;;  %v2618_v6 = vld [vmem:[%s2614_s9 + $0x4] sm:$0xf]  ;;  %v2624_v8 = vld [vmem:[%s2614_s9 + $0x8] sm:$0xff]   ;;  %s2808_s19 = scalar_lea.vmem %s3119_s2, %s2454_s16 }
  0x13   : > { %v2621_v7 = vcombine.low %v342_v5, %v2618_v6  ;;  %v727_v9 = vld [vmem:[%s2614_s9 + $0x4] sm:$0xe]  ;;  %v2628_v10 = vld [vmem:[%s2614_s9 + $0x8] sm:$0xf]  ;;  %v393_v13 = vshll.u32 %v2624_v8, 16  ;;  %v2637_v15 = vld [vmem:[%s2614_s9 + $0xc] sm:$0xff]   ;;  %s3062_s15 = scalar_lea.vmem %s3123_s6, %s2455_s12 }
  0x14   : > { %v2634_v14 = vcombine.low %v727_v9, %v2628_v10  ;;  %v2643_v17 = vld [vmem:[%s2614_s9 + $0x10] sm:$0xff]   ;;  %v896_v22 = vshrl.u32 %v2637_v15, 16  ;;  %v899_v23 = vshll.u32 %v2637_v15, 16  ;;  %v397_v25 = vshrl.u32 %v2624_v8, 16  ;;  %v2662_v38 = vld [vmem:[%s2614_s9 + $0x1c] sm:$0xff]   ;;  %v2683_v53 = vld [vmem:[%s2614_s9 + $0x24] sm:$0xff]  }
  0x15   : > { %v386_v11 = vshrl.u32 %v2621_v7, 16  ;;  %v388_v12 = vshll.u32 %v2621_v7, 16  ;;  %v395_v19 = vrot.slane %v393_v13, 1  ;;  %v2654_v26 = vld [vmem:[%s2614_s9 + $0x14] sm:$0xff]   ;;  %v401_v30 = vshll.u32 %v2643_v17, 16  ;;  %v2690_v59 = vld [vmem:[%s2614_s9 + $0x20] sm:$0xff]  }
  0x16   : > { %v888_v20 = vshrl.u32 %v2634_v14, 16  ;;  %v891_v21 = vshll.u32 %v2634_v14, 16  ;;  %v898_v31 = vrot.slane %v896_v22, 1  ;;  %v901_v32 = vrot.slane %v899_v23, 2  ;;  %v2669_v45 = vld [vmem:[%s2614_s9 + $0x18] sm:$0xff]   ;;  %v2697_v0 = vld [vmem:[%s2614_s9 + $0x20] sm:$0xff]  }
  0x17   : > { %v390_v18 = vrot.slane %v388_v12, 1  ;;  %v905_v34 = vshrl.u32 %v2654_v26, 16  ;;  %v908_v37 = vshll.u32 %v2654_v26, 16  ;;  %v399_v42 = vor.u32 %v397_v25, %v395_v19  ;;  %v608_v60 = vld [vmem:[%s2614_s9] sm:$0xe]  ;;  %v2704_v4 = vld [vmem:[%s2614_s9 + $0x28] sm:$0xff]  }
  0x18   : > { %v890_v28 = vrot.slane %v888_v20, 1  ;;  %v893_v29 = vrot.slane %v891_v21, 2  ;;  %v902_v39 = vor.u32 %v901_v32, %v898_v31  ;;  %v403_v43 = vrot.slane %v401_v30, 1  ;;  %v2713_v20 = vld [vmem:[%s2614_s9 + $0x28] ss:$0 sps:$4 sm:$0x11]  }
  0x19   : > { %v391_v27 = vor.u32 %v390_v18, %v386_v11  ;;  %v907_v40 = vrot.slane %v905_v34, 1  ;;  %v910_v44 = vrot.slane %v908_v37, 2  ;;  %v914_v47 = vshrl.u32 %v2662_v38, 16  ;;  %v2501_v22 = vld [vmem:[%s2614_s9 + $0x30] ss:$0 sps:$4 sm:$0x33]  }
  0x1a   : > { %v894_v36 = vor.u32 %v893_v29, %v890_v28  ;;  %v917_v48 = vshll.u32 %v2662_v38, 16  ;;  %v404_v50 = vsel %vm384_vm2, %v399_v42, %v403_v43  ;;  %v405_v51 = vshrl.u32 %v2643_v17, 16  ;;  %v2721_v23 = vld [vmem:[%s2614_s9 + $0x2c] ss:$0 sps:$4 sm:$0x33]  }
  0x1b   : > { %v396_v35 = vsel %vm384_vm2, %v391_v27, %v395_v19  ;;  %v911_v49 = vor.u32 %v910_v44, %v907_v40  ;;  %v409_v52 = vshll.u32 %v2669_v45, 16  ;;  %v916_v54 = vrot.slane %v914_v47, 1  ;;  %v2502_v47 = vld [vmem:[%s2614_s9 + $0x2c] ss:$0 sps:$4 sm:$0x11]  }
  0x1c   : > { %2086 = vmatmul.mubr.msk.bf16.vlgmr.msra.gmra.mrb[0].mxu1 %vm429_vm4, %v396_v35  ;;  %v903_v46 = vsel %vm886_vm3, %v894_v36, %v902_v39  ;;  %v919_v55 = vrot.slane %v917_v48, 2  ;;  %v407_v57 = vor.u32 %v405_v51, %v403_v43  ;;  %v923_v61 = vshrl.u32 %v2683_v53, 16 }
  0x1d   : > { %2106 = vmatpush3.bf16.msra.mxu1 %v533_v33  ;;  %2089 = vmatprep.mubr.msk.bf16.mxu1 %vm2535_vm1, %v2534_v2  ;;  %v912_v56 = vsel %vm886_vm3, %v902_v39, %v911_v49  ;;  %v411_v58 = vrot.slane %v409_v52, 1  ;;  %v926_v63 = vshll.u32 %v2683_v53, 16  ;;  %v1952_v1 = vcombine.low %v608_v60, %v2618_v6  ;;  %v2777_v60 = vld [vmem:[%s2614_s9 + $0xc] sm:$0xf] }
  0x1e   : > { %2127 = vmatprep.subr.bf16.mxu1 %v2534_v2  ;;  %2174 = vmatmul.mubr.msk.bf16.vlgmr.msra.gmra.mrb[0].mxu0 %vm429_vm4, %v903_v46  ;;  %v920_v62 = vor.u32 %v919_v55, %v916_v54  ;;  %v616_v3 = vrot.slane %v2624_v8, 1  ;;  %v413_v9 = vshrl.u32 %v2669_v45, 16  ;;  %v417_v11 = vshll.u32 %v2690_v59, 16 }
  0x1f   : > { %2194 = vmatpush3.bf16.msra.mxu0 %v1075_v41  ;;  %2177 = vmatprep.mubr.msk.bf16.mxu0 %vm2535_vm1, %v2534_v2  ;;  %v412_v5 = vsel %vm384_vm2, %v407_v57, %v411_v58  ;;  %v618_v12 = vrot.slane %v2643_v17, 1  ;;  %v615_v13 = vrot.slane %v1952_v1, 1  ;;  %v620_v16 = vrot.slane %v2669_v45, 1  ;;  %v2783_v1 = vld [vmem:[%s2614_s9 + $0x10] sm:$0xff]  }
  0x20   : > { %2215 = vmatprep.subr.bf16.mxu0 %v2534_v2  ;;  %v921_v18 = vsel %vm886_vm3, %v911_v49, %v920_v62  ;;  %v925_v6 = vrot.slane %v923_v61, 1  ;;  %v928_v19 = vrot.slane %v926_v63, 2  ;;  %v1206_v27 = vrot.slane %v2697_v0, 2  ;;  %v1474_v61 = vld [vmem:[%s2614_s9 + $0x8] sm:$0x8] }
  0x21   : > { %v2716_v21 = vsel %vm614_vm5, %v616_v3, %v618_v12  ;;  %v2724_v24 = vsel %vm614_vm5, %v615_v13, %v616_v3  ;;  %v2729_v25 = vsel %vm614_vm5, %v618_v12, %v620_v16  ;;  %v1208_v28 = vrot.slane %v2704_v4, 2  ;;  %v1041_v63 = vld [vmem:[%s2614_s9 + $0x4] sm:$0xc] }
  0x22   : > { %v415_v29 = vor.u32 %v413_v9, %v411_v58  ;;  %v419_v30 = vrot.slane %v417_v11, 1  ;;  %v1210_v31 = vrot.slane %v2501_v22, 2  ;;  %v768_v33 = vrot.slane %v2634_v14, 1 }
  0x23   : > { %v2738_v32 = vsel %vm1047_vm6, %v1206_v27, %v1208_v28  ;;  %v769_v34 = vrot.slane %v2637_v15, 1  ;;  %v929_v36 = vor.u32 %v928_v19, %v925_v6  ;;  %v932_v37 = vshrl.u32 %v2721_v23, 16  ;;  %v2803_v19 = vld [vmem:[%s2614_s9 + $0x18] sm:$0xff]  }
  0x24   : > { %2090 = vmatmul.mubr.msk.bf16.gmra.mrb[4].mxu1 %vm429_vm4, %v404_v50  ;;  %v2744_v35 = vsel %vm1047_vm6, %v1208_v28, %v1210_v31  ;;  %v935_v39 = vshll.u32 %v2721_v23, 16  ;;  %v420_v14 = vsel %vm384_vm2, %v415_v29, %v419_v30  ;;  %v421_v41 = vshrl.u32 %v2690_v59, 16  ;;  %v1984_v29 = vld [vmem:[%s3118_s1 + $0x18] sm:$0xf] }
  0x25   : > { %2093 = vmatprep.mubr.msk.bf16.mxu1 %vm2535_vm1, %v2534_v2  ;;  %v2751_v40 = vsel %vm614_vm5, %v768_v33, %v769_v34  ;;  %v425_v42 = vshll.u32 %v2713_v20, 16  ;;  %v771_v43 = vrot.slane %v2654_v26, 1  ;;  %v773_v46 = vrot.slane %v2662_v38, 1 }
  0x26   : > { %2178 = vmatmul.mubr.msk.bf16.gmra.mrb[4].mxu0 %vm429_vm4, %v912_v56  ;;  %v930_v48 = vsel %vm886_vm3, %v920_v62, %v929_v36  ;;  %v934_v49 = vrot.slane %v932_v37, 1  ;;  %v937_v50 = vrot.slane %v935_v39, 2  ;;  %v423_v51 = vor.u32 %v421_v41, %v419_v30  ;;  %v2857_v41 = vld [vmem:[%s2614_s9 + $0x30] ss:$0 sps:$4 sm:$0x77]  }
  0x27   : > { %2181 = vmatprep.mubr.msk.bf16.mxu0 %vm2535_vm1, %v2534_v2  ;;  %v2758_v44 = vsel %vm614_vm5, %v769_v34, %v771_v43  ;;  %v427_v52 = vrot.slane %v425_v42, 1  ;;  %v2767_v54 = vsel %vm614_vm5, %v771_v43, %v773_v46  ;;  %v775_v55 = vrot.slane %v2683_v53, 1 }
  0x28   : > { %v777_v57 = vrot.slane %v2502_v47, 1  ;;  %v938_v58 = vor.u32 %v937_v50, %v934_v49  ;;  %v1482_v11 = vrot.slane %v2783_v1, 3  ;;  %v1978_v13 = vcombine.low %v1041_v63, %v2628_v10  ;;  %v1958_v49 = vld [vmem:[%s3118_s1 + $0xc] sm:$0xf] }
  0x29   : > { %v2772_v56 = vsel %vm614_vm5, %v773_v46, %v775_v55  ;;  %v428_v62 = vsel %vm384_vm2, %v423_v51, %v427_v52  ;;  %v1049_v10 = vrot.slane %v2637_v15, 2  ;;  %v1484_v30 = vrot.slane %v2803_v19, 3  ;;  %v1160_v46 = vld [vmem:[%s2614_s9 + $0x8] sm:$0xc]  ;;  %v1996_v51 = vld [vmem:[%s3118_s1 + $0x1c] sm:$0xf] }
  0x2a   : > { %v2786_v3 = vsel %vm614_vm5, %v775_v55, %v777_v57  ;;  %v939_v12 = vsel %vm886_vm3, %v929_v36, %v938_v58  ;;  %v1048_v28 = vrot.slane %v1978_v13, 2  ;;  %v1228_v33 = vsel %vm445_vm0, %v1984_v29, 0  ;;  %s1759_s9 = sld [smem:[#allocation2]] }
  0x2b   : > { %v2820_v31 = vsel %vm1480_vm7, %v1482_v11, %v1484_v30  ;;  %v1051_v34 = vrot.slane %v2654_v26, 2  ;;  %v1053_v26 = vrot.slane %v2662_v38, 2  ;;  %v1488_v39 = vrot.slane %v2704_v4, 3 }
  0x2c   : > { %2094 = vmatmul.mubr.msk.bf16.gmra.mrb[8].mxu1 %vm429_vm4, %v412_v5  ;;  %v2004_v5 = vcombine.low %v1474_v61, %v2777_v60  ;;  %v1050_v15 = vsel %vm1047_vm6, %v1048_v28, %v1049_v10  ;;  %v1055_v38 = vrot.slane %v2683_v53, 2  ;;  %v1490_v42 = vrot.slane %v2857_v41, 3 }
  0x2d   : > { %2097 = vmatprep.mubr.msk.bf16.mxu1 %vm2535_vm1, %v2534_v2  ;;  %v1052_v37 = vsel %vm1047_vm6, %v1049_v10, %v1051_v34  ;;  %v1057_v53 = vrot.slane %v2721_v23, 2  ;;  %v1202_v50 = vrot.slane %v2783_v1, 2  ;;  %v795_v52 = vsel %vm445_vm0, %v1958_v49, 0 }
  0x2e   : > { %2182 = vmatmul.mubr.msk.bf16.gmra.mrb[8].mxu0 %vm429_vm4, %v921_v18  ;;  %v1481_v9 = vrot.slane %v2004_v5, 3  ;;  %v1951_v18 = vld [vmem:[%s3118_s1 + $0x8] sm:$0xf]  ;;  %v2865_v43 = vsel %vm1480_vm7, %v1488_v39, %v1490_v42  ;;  %v1389_v57 = vsel %vm445_vm0, %v1996_v51, 0  ;;  %v1204_v58 = vrot.slane %v2803_v19, 2 }
  0x2f   : > { %2185 = vmatprep.mubr.msk.bf16.mxu0 %vm2535_vm1, %v2534_v2  ;;  %v642_v22 = vsel %vm445_vm0, %v1951_v18, 0  ;;  %v1058_v47 = vsel %vm1047_vm6, %v1055_v38, %v1057_v53  ;;  %v1341_v13 = vshll.u32 %v2803_v19, 16  ;;  %v2003_v18 = vld [vmem:[%s3118_s1 + $0x20] sm:$0xf] }
  0x30   : > { %v2800_v6 = vsel %vm1480_vm7, %v1481_v9, %v1482_v11  ;;  %v1508_v29 = vsel %vm445_vm0, %v2003_v18, 0 }
  0x31   : > { %v1343_v28 = vrot.slane %v1341_v13, 3 }
  0x34   : > { %2098 = vmatmul.mubr.msk.bf16.gmra.mrb[12].mxu1 %vm429_vm4, %v420_v14 }
  0x35   : > { %2101 = vmatprep.mubr.msk.bf16.mxu1 %vm2535_vm1, %v2534_v2 }
  0x36   : > { %2186 = vmatmul.mubr.msk.bf16.gmra.mrb[12].mxu0 %vm429_vm4, %v930_v48  ;;  %v1985_v48 = vcombine.low %v1160_v46, %v2777_v60  ;;  %v1207_v60 = vsel %vm1047_vm6, %v1204_v58, %v1206_v27  ;;  %v2507_v46 = vld [vmem:[%s2808_s19 + $0x10] sm:$0xff]  }
  0x37   : > { %2189 = vmatprep.mubr.msk.bf16.mxu0 %vm2535_vm1, %v2534_v2 }
  0x38   : > { %v1201_v23 = vrot.slane %v1985_v48, 2  ;;  %v1324_v27 = vshll.u32 %v1985_v48, 16 }
  0x3a   : > { %v1203_v55 = vsel %vm1047_vm6, %v1201_v23, %v1202_v50  ;;  %v1326_v5 = vrot.slane %v1324_v27, 3 }
  0x3c   : > { %2102 = vmatmul.mubr.msk.bf16.gmra.mrb[16].mxu1 %vm429_vm4, %v428_v62  ;;  %v1329_v62 = vshrl.u32 %v2783_v1, 16 }
  0x3d   : > { %2107 = vmatprep.mubr.msk.bf16.mxu1 %vm2535_vm1, %v2534_v2 }
  0x3e   : > { %2190 = vmatmul.mubr.msk.bf16.gmra.mrb[16].mxu0 %vm429_vm4, %v939_v12  ;;  %v1331_v9 = vrot.slane %v1329_v62, 2  ;;  %v1338_v12 = vshrl.u32 %v2803_v19, 16 }
  0x3f   : > { %2195 = vmatprep.mubr.msk.bf16.mxu0 %vm2535_vm1, %v2534_v2 }
  0x44   : > { %2108 = vmatmul.mubr.msk.bf16.vlgmr.msra.gmra.mrb[0].mxu1 %vm429_vm4, %v2621_v7  ;;  %v1486_v7 = vrot.slane %v2697_v0, 3 }
  0x45   : > { %2128 = vmatpush3.bf16.msra.mxu1 %v642_v22  ;;  %2111 = vmatprep.mubr.msk.bf16.mxu1 %vm2535_vm1, %v2534_v2  ;;  %v1340_v22 = vrot.slane %v1338_v12, 2  ;;  %v3055_v12 = vstv %s1759_s9 }
  0x46   : > { %2149 = vmatprep.subr.bf16.mxu1 %v2534_v2  ;;  %2196 = vmatmul.mubr.msk.bf16.vlgmr.msra.gmra.mrb[0].mxu0 %vm429_vm4, %v1050_v15  ;;  %v2836_v36 = vsel %vm1480_vm7, %v1484_v30, %v1486_v7  ;;  %v2849_v14 = vsel %vm1480_vm7, %v1486_v7, %v1488_v39  ;;  %v1347_v30 = vshrl.u32 %v2697_v0, 16 }
  0x47   : > { %2216 = vmatpush3.bf16.msra.mxu0 %v1228_v33  ;;  %2199 = vmatprep.mubr.msk.bf16.mxu0 %vm2535_vm1, %v2534_v2  ;;  %v1344_v19 = vor.u32 %v1343_v28, %v1340_v22 }
  0x48   : > { %2237 = vmatprep.subr.bf16.mxu0 %v2534_v2  ;;  %v1349_v33 = vrot.slane %v1347_v30, 2 }
  0x4c   : > { %2112 = vmatmul.mubr.msk.bf16.gmra.mrb[4].mxu1 %vm429_vm4, %v2624_v8  ;;  %v1054_v8 = vsel %vm1047_vm6, %v1051_v34, %v1053_v26 }
  0x4d   : > { %2115 = vmatprep.mubr.msk.bf16.mxu1 %vm2535_vm1, %v2534_v2 }
  0x4e   : > { %2200 = vmatmul.mubr.msk.bf16.gmra.mrb[4].mxu0 %vm429_vm4, %v1052_v37  ;;  %v1356_v37 = vshrl.u32 %v2704_v4, 16 }
  0x4f   : > { %2203 = vmatprep.mubr.msk.bf16.mxu0 %vm2535_vm1, %v2534_v2 }
  0x54   : > { %2116 = vmatmul.mubr.msk.bf16.gmra.mrb[8].mxu1 %vm429_vm4, %v2643_v17  ;;  %v1056_v17 = vsel %vm1047_vm6, %v1053_v26, %v1055_v38  ;;  %v1358_v26 = vrot.slane %v1356_v37, 2  ;;  %v1365_v38 = vshrl.u32 %v2857_v41, 16 }
  0x55   : > { %2119 = vmatprep.mubr.msk.bf16.mxu1 %vm2535_vm1, %v2534_v2 }
  0x56   : > { %2204 = vmatmul.mubr.msk.bf16.gmra.mrb[8].mxu0 %vm429_vm4, %v1054_v8  ;;  %v1367_v42 = vrot.slane %v1365_v38, 2 }
  0x57   : > { %2207 = vmatprep.mubr.msk.bf16.mxu0 %vm2535_vm1, %v2534_v2 }
  0x5c   : > { %2120 = vmatmul.mubr.msk.bf16.gmra.mrb[12].mxu1 %vm429_vm4, %v2669_v45  ;;  %v1332_v45 = vshll.u32 %v2783_v1, 16 }
  0x5d   : > { %2123 = vmatprep.mubr.msk.bf16.mxu1 %vm2535_vm1, %v2534_v2 }
  0x5e   : > { %2208 = vmatmul.mubr.msk.bf16.gmra.mrb[12].mxu0 %vm429_vm4, %v1056_v17 }
  0x5f   : > { %2211 = vmatprep.mubr.msk.bf16.mxu0 %vm2535_vm1, %v2534_v2 }
  0x64   : > { %2124 = vmatmul.mubr.msk.bf16.gmra.mrb[16].mxu1 %vm429_vm4, %v2690_v59 }
  0x65   : > { %2129 = vmatprep.mubr.msk.bf16.mxu1 %vm2535_vm1, %v2534_v2 }
  0x66   : > { %2212 = vmatmul.mubr.msk.bf16.gmra.mrb[16].mxu0 %vm429_vm4, %v1058_v47 }
  0x67   : > { %2217 = vmatprep.mubr.msk.bf16.mxu0 %vm2535_vm1, %v2534_v2 }
  0x6c   : > { %2130 = vmatmul.mubr.msk.bf16.vlgmr.msra.gmra.mrb[0].mxu1 %vm429_vm4, %v2724_v24  ;;  %v1205_v24 = vsel %vm1047_vm6, %v1202_v50, %v1204_v58 }
  0x6d   : > { %2150 = vmatpush3.bf16.msra.mxu1 %v795_v52  ;;  %2133 = vmatprep.mubr.msk.bf16.mxu1 %vm2535_vm1, %v2534_v2 }
  0x6e   : > { %2281 = vmatprep.subr.bf16.mxu1 %v2534_v2  ;;  %2218 = vmatmul.mubr.msk.bf16.vlgmr.msra.gmra.mrb[0].mxu0 %vm429_vm4, %v1203_v55 }
  0x6f   : > { %2238 = vmatpush3.bf16.msra.mxu0 %v1389_v57  ;;  %2221 = vmatprep.mubr.msk.bf16.mxu0 %vm2535_vm1, %v2534_v2 }
  0x70   : > { %2259 = vmatprep.subr.bf16.mxu0 %v2534_v2 }
  0x74   : > { %2134 = vmatmul.mubr.msk.bf16.gmra.mrb[4].mxu1 %vm429_vm4, %v2716_v21  ;;  %v622_v21 = vrot.slane %v2690_v59, 1  ;;  %v1321_v59 = vshrl.u32 %v1985_v48, 16 }
  0x75   : > { %2137 = vmatprep.mubr.msk.bf16.mxu1 %vm2535_vm1, %v2534_v2 }
  0x76   : > { %2222 = vmatmul.mubr.msk.bf16.gmra.mrb[4].mxu0 %vm429_vm4, %v1205_v24  ;;  %v623_v61 = vsel %vm614_vm5, %v620_v16, %v622_v21  ;;  %v1323_v63 = vrot.slane %v1321_v59, 2 }
  0x77   : > { %2225 = vmatprep.mubr.msk.bf16.mxu0 %vm2535_vm1, %v2534_v2 }
  0x78   : > { %v1327_v1 = vor.u32 %v1326_v5, %v1323_v63 }
  0x7c   : > { %2138 = vmatmul.mubr.msk.bf16.gmra.mrb[8].mxu1 %vm429_vm4, %v2729_v25  ;;  %v624_v25 = vrot.slane %v2713_v20, 1  ;;  %v1334_v20 = vrot.slane %v1332_v45, 3 }
  0x7d   : > { %2141 = vmatprep.mubr.msk.bf16.mxu1 %vm2535_vm1, %v2534_v2 }
  0x7e   : > { %2226 = vmatmul.mubr.msk.bf16.gmra.mrb[8].mxu0 %vm429_vm4, %v1207_v60  ;;  %v625_v16 = vsel %vm614_vm5, %v622_v21, %v624_v25  ;;  %v1335_v11 = vor.u32 %v1334_v20, %v1331_v9  ;;  %v3052_v20 = vld [vmem:[%s3121_s4] ss:$0 sm:$0xff] }
  0x7f   : > { %2229 = vmatprep.mubr.msk.bf16.mxu0 %vm2535_vm1, %v2534_v2 }
  0x80   : > { %v1336_v10 = vsel %vm1319_vm9, %v1327_v1, %v1335_v11  ;;  %v1345_v15 = vsel %vm1319_vm9, %v1335_v11, %v1344_v19 }
  0x84   : > { %2142 = vmatmul.mubr.msk.bf16.gmra.mrb[12].mxu1 %vm429_vm4, %v623_v61 }
  0x85   : > { %2145 = vmatprep.mubr.msk.bf16.mxu1 %vm2535_vm1, %v2534_v2 }
  0x86   : > { %2230 = vmatmul.mubr.msk.bf16.gmra.mrb[12].mxu0 %vm429_vm4, %v2738_v32  ;;  %v1633_v32 = vld [vmem:[%s3120_s3] sm:$0x3] }
  0x87   : > { %2233 = vmatprep.mubr.msk.bf16.mxu0 %vm2535_vm1, %v2534_v2 }
  0x8c   : > { %2146 = vmatmul.mubr.msk.bf16.gmra.mrb[16].mxu1 %vm429_vm4, %v625_v16 }
  0x8d   : > { %2151 = vmatprep.mubr.msk.bf16.mxu1 %vm2535_vm1, %v2534_v2 }
  0x8e   : > { %2234 = vmatmul.mubr.msk.bf16.gmra.mrb[16].mxu0 %vm429_vm4, %v2744_v35  ;;  %v1684_v35 = vsel %vm1682_vm8, %v1633_v32, 0 }
  0x8f   : > { %2239 = vmatprep.mubr.msk.bf16.mxu0 %vm2535_vm1, %v2534_v2 }
  0x94   : > { %2152 = vmatmul.mubr.msk.bf16.vlgmr.msra.gmra.mrb[0].mxu1 %vm429_vm4, %v2751_v40  ;;  %v1350_v40 = vshll.u32 %v2697_v0, 16  ;;  %v1359_v0 = vshll.u32 %v2704_v4, 16  ;;  %v1368_v4 = vshll.u32 %v2857_v41, 16  ;;  %v2505_v41 = vld [vmem:[%s2808_s19] sm:$0xff]  }
  0x95   : > { %2282 = vmatpush3.bf16.msra.mxu1 %v1684_v35  ;;  %2155 = vmatprep.mubr.msk.bf16.mxu1 %vm2535_vm1, %v2534_v2 }
  0x96   : > { %2240 = vmatmul.mubr.msk.bf16.vlgmr.msra.gmra.mrb[0].mxu0 %vm429_vm4, %v1336_v10  ;;  %v1352_v34 = vrot.slane %v1350_v40, 3  ;;  %v1361_v39 = vrot.slane %v1359_v0, 3  ;;  %v1370_v17 = vrot.slane %v1368_v4, 3 }
  0x97   : > { %2260 = vmatpush3.bf16.msra.mxu0 %v1508_v29  ;;  %2243 = vmatprep.mubr.msk.bf16.mxu0 %vm2535_vm1, %v2534_v2 }
  0x98   : > { %v1353_v7 = vor.u32 %v1352_v34, %v1349_v33  ;;  %v1362_v8 = vor.u32 %v1361_v39, %v1358_v26  ;;  %v1371_v53 = vor.u32 %v1370_v17, %v1367_v42 }
  0x9c   : > { %2156 = vmatmul.mubr.msk.bf16.gmra.mrb[4].mxu1 %vm429_vm4, %v2758_v44  ;;  %v1354_v44 = vsel %vm1319_vm9, %v1344_v19, %v1353_v7 }
  0x9d   : > { %2159 = vmatprep.mubr.msk.bf16.mxu1 %vm2535_vm1, %v2534_v2 }
  0x9e   : > { %2244 = vmatmul.mubr.msk.bf16.gmra.mrb[4].mxu0 %vm429_vm4, %v1345_v15 }
  0x9f   : > { %2247 = vmatprep.mubr.msk.bf16.mxu0 %vm2535_vm1, %v2534_v2 }
  0xa4   : > { %2160 = vmatmul.mubr.msk.bf16.gmra.mrb[8].mxu1 %vm429_vm4, %v2767_v54  ;;  %v1363_v54 = vsel %vm1319_vm9, %v1353_v7, %v1362_v8 }
  0xa5   : > { %2163 = vmatprep.mubr.msk.bf16.mxu1 %vm2535_vm1, %v2534_v2 }
  0xa6   : > { %2248 = vmatmul.mubr.msk.bf16.gmra.mrb[8].mxu0 %vm429_vm4, %v1354_v44 }
  0xa7   : > { %2251 = vmatprep.mubr.msk.bf16.mxu0 %vm2535_vm1, %v2534_v2 }
  0xac   : > { %2164 = vmatmul.mubr.msk.bf16.gmra.mrb[12].mxu1 %vm429_vm4, %v2772_v56  ;;  %v1372_v56 = vsel %vm1319_vm9, %v1362_v8, %v1371_v53 }
  0xad   : > { %2167 = vmatprep.mubr.msk.bf16.mxu1 %vm2535_vm1, %v2534_v2 }
  0xae   : > { %2252 = vmatmul.mubr.msk.bf16.gmra.mrb[12].mxu0 %vm429_vm4, %v1363_v54 }
  0xaf   : > { %2255 = vmatprep.mubr.msk.bf16.mxu0 %vm2535_vm1, %v2534_v2 }
  0xb4   : > { %2168 = vmatmul.mubr.msk.bf16.gmra.mrb[16].mxu1 %vm429_vm4, %v2786_v3  ;;  %v2506_v3 = vld [vmem:[%s2808_s19 + $0x8] sm:$0xff]  }
  0xb5   : > { %2283 = vmatprep.mubr.msk.bf16.mxu1 %vm2535_vm1, %v2534_v2 }
  0xb6   : > { %2256 = vmatmul.mubr.msk.bf16.gmra.mrb[16].mxu0 %vm429_vm4, %v1372_v56 }
  0xb7   : > { %2261 = vmatprep.mubr.msk.bf16.mxu0 %vm2535_vm1, %v2534_v2 }
  0xbc   : > { %2284 = vmatmul.mubr.msk.bf16.vlgmr.msra.gmra.mrb[20].mxu1 %vm1666_vm10, %v2505_v41 }
  0xbd   : > { %2287 = vmatprep.mubr.msk.bf16.mxu1 %vm2535_vm1, %v2534_v2 }
  0xbe   : > { %2262 = vmatmul.mubr.msk.bf16.vlgmr.msra.gmra.mrb[0].mxu0 %vm429_vm4, %v2800_v6  ;;  %v2508_v6 = vld [vmem:[%s2808_s19 + $0x18] sm:$0xff]  }
  0xbf   : > { %2265 = vmatprep.mubr.msk.bf16.mxu0 %vm2535_vm1, %v2534_v2 }
  0xc4   : > { %2288 = vmatmul.mubr.msk.bf16.gmra.mrb[24].mxu1 %vm1666_vm10, %v2506_v3 }
  0xc5   : > { %2291 = vmatprep.mubr.msk.bf16.mxu1 %vm2535_vm1, %v2534_v2 }
  0xc6   : > { %2266 = vmatmul.mubr.msk.bf16.gmra.mrb[4].mxu0 %vm429_vm4, %v2820_v31  ;;  %v2509_v31 = vld [vmem:[%s2808_s19 + $0x20] sm:$0xff]  }
  0xc7   : > { %2269 = vmatprep.mubr.msk.bf16.mxu0 %vm2535_vm1, %v2534_v2 }
  0xcc   : > { %2292 = vmatmul.mubr.msk.bf16.gmra.mrb[28].mxu1 %vm1666_vm10, %v2507_v46 }
  0xcd   : > { %2295 = vmatprep.mubr.msk.bf16.mxu1 %vm2535_vm1, %v2534_v2 }
  0xce   : > { %2270 = vmatmul.mubr.msk.bf16.gmra.mrb[8].mxu0 %vm429_vm4, %v2836_v36 }
  0xcf   : > { %2273 = vmatprep.mubr.msk.bf16.mxu0 %vm2535_vm1, %v2534_v2 }
  0xd4   : > { %2296 = vmatmul.mubr.msk.bf16.gmra.mrb[32].mxu1 %vm1666_vm10, %v2508_v6 }
  0xd5   : > { %2299 = vmatprep.mubr.msk.bf16.mxu1 %vm2535_vm1, %v2534_v2 }
  0xd6   : > { %2274 = vmatmul.mubr.msk.bf16.gmra.mrb[12].mxu0 %vm429_vm4, %v2849_v14 }
  0xd7   : > { %2277 = vmatprep.mubr.msk.bf16.mxu0 %vm2535_vm1, %v2534_v2 }
  0xdc   : > { %2300 = vmatmul.mubr.msk.bf16.gmra.mrb[36].mxu1 %vm1666_vm10, %v2509_v31 }
  0xde   : > { %2278 = vmatmul.mubr.msk.bf16.gmra.mrb[16].mxu0 %vm429_vm4, %v2865_v43 }
 0x167   : > { %v831_v36 = vpop.f32.mrb[0].mxu1 }
 0x168   : > { %v2153_v47 = vpop.f32.mrb[1].mxu1 }
 0x169   : > { %v834_v48 = vpop.f32.mrb[2].mxu1 }
 0x16a   : > { %v2154_v49 = vpop.f32.mrb[3].mxu1 }
 0x16f   : > { %v839_v23 = vpop.f32.mrb[4].mxu1 }
 0x170   : > { %v2157_v50 = vpop.f32.mrb[5].mxu1 }
 0x171   : > { %v842_v51 = vpop.f32.mrb[6].mxu1 }
 0x172   : > { %v2158_v52 = vpop.f32.mrb[7].mxu1 }
 0x177   : > { %v3037_v55 = vpop.f32.mrb[8].mxu1 }
 0x178   : > { %v2161_v14 = vpop.f32.mrb[9].mxu1 }
 0x179   : > { %v3039_v57 = vpop.f32.mrb[10].mxu1 }
 0x17a   : > { %v2162_v2 = vpop.f32.mrb[11].mxu1 }
 0x17f   : > { %v3041_v58 = vpop.f32.mrb[12].mxu1 }
 0x180   : > { %v2165_v24 = vpop.f32.mrb[13].mxu1 }
 0x181   : > { %v3043_v60 = vpop.f32.mrb[14].mxu1 }
 0x182   : > { %v2166_v43 = vpop.f32.mrb[15].mxu1 }
 0x187   : > { %v3045_v21 = vpop.f32.mrb[16].mxu1 }
 0x188   : > { %v2169_v61 = vpop.f32.mrb[17].mxu1 }
 0x189   : > { %v3047_v25 = vpop.f32.mrb[18].mxu1 }
 0x18a   : > { %v2170_v59 = vpop.f32.mrb[19].mxu1 }
 0x18f   : > { %v1720_v27 = vpop.f32.mrb[20].mxu1 }
 0x190   : > { %v2285_v62 = vpop.f32.mrb[21].mxu1  ;;  %v1721_v18 = vadd.f32 %v3052_v20, %v1720_v27 }
 0x191   : > { %v1723_v45 = vpop.f32.mrb[22].mxu1  ;;  %v1544_v16 = vpop.f32.mrb[0].mxu0 }
 0x192   : > { %v2286_v63 = vpop.f32.mrb[23].mxu1  ;;  %v2303_v5 = vadd.f32 %v1544_v16, %v831_v36  ;;  %v2263_v9 = vpop.f32.mrb[1].mxu0  ;;  %v1724_v15 = vadd.f32 %v3052_v20, %v1723_v45 }
 0x193   : > { %v1547_v32 = vpop.f32.mrb[2].mxu0 }
 0x194   : > { %vm1593_vm11 = vcmp.ge.f32.partialorder %v2303_v5, 0.0  ;;  %v1603_v1 = vmul.f32 0.2, %v2303_v5  ;;  %v2304_v11 = vadd.f32 %v1547_v32, %v834_v48  ;;  %v2264_v13 = vpop.f32.mrb[3].mxu0 }
 0x196   : > { %v1613_v35 = vsel %vm1593_vm11, %v2303_v5, %v1603_v1  ;;  %vm1594_vm12 = vcmp.ge.f32.partialorder %v2304_v11, 0.0  ;;  %v1604_v10 = vmul.f32 0.2, %v2304_v11 }
 0x197   : > { %v1728_v22 = vpop.f32.mrb[24].mxu1  ;;  %v1761_v28 = vmul.f32 %v3055_v12, %v1613_v35 }
 0x198   : > { %v2289_v29 = vpop.f32.mrb[25].mxu1  ;;  %v1614_v19 = vsel %vm1594_vm12, %v2304_v11, %v1604_v10  ;;  %v1729_v4 = vadd.f32 %v3052_v20, %v1728_v22 }
 0x199   : > { %v1731_v30 = vpop.f32.mrb[26].mxu1  ;;  %v1771_v40 = vadd.f32 %v1761_v28, %v1721_v18  ;;  %v1762_v33 = vmul.f32 %v3055_v12, %v1614_v19  ;;  %v1552_v34 = vpop.f32.mrb[4].mxu0 }
 0x19a   : > { %v2290_v7 = vpop.f32.mrb[27].mxu1  ;;  %v2305_v37 = vadd.f32 %v1552_v34, %v839_v23  ;;  %v2267_v0 = vpop.f32.mrb[5].mxu0  ;;  %v1732_v6 = vadd.f32 %v3052_v20, %v1731_v30 }
 0x19b   : > { %1781 = vst.msk [vmem:[%s3062_s15] sm:$0xff] %vm429_vm4, %v1771_v40  ;;  %v1772_v44 = vadd.f32 %v1762_v33, %v1724_v15  ;;  %v1555_v26 = vpop.f32.mrb[6].mxu0 }
 0x19c   : > { %vm1595_vm13 = vcmp.ge.f32.partialorder %v2305_v37, 0.0  ;;  %v1605_v39 = vmul.f32 0.2, %v2305_v37  ;;  %v2306_v8 = vadd.f32 %v1555_v26, %v842_v51  ;;  %v2268_v38 = vpop.f32.mrb[7].mxu0 }
 0x19d   : > { %1782 = vst.msk [vmem:[%s3062_s15 + $0x8] sm:$0xff] %vm429_vm4, %v1772_v44 }
 0x19e   : > { %v1615_v54 = vsel %vm1595_vm13, %v2305_v37, %v1605_v39  ;;  %vm1596_vm14 = vcmp.ge.f32.partialorder %v2306_v8, 0.0  ;;  %v1606_v42 = vmul.f32 0.2, %v2306_v8 }
 0x19f   : > { %v1736_v17 = vpop.f32.mrb[28].mxu1  ;;  %v1763_v53 = vmul.f32 %v3055_v12, %v1615_v54 }
 0x1a0   : > { %v2293_v56 = vpop.f32.mrb[29].mxu1  ;;  %v1616_v41 = vsel %vm1596_vm14, %v2306_v8, %v1606_v42  ;;  %v1737_v2 = vadd.f32 %v3052_v20, %v1736_v17 }
 0x1a1   : > { %v1739_v3 = vpop.f32.mrb[30].mxu1  ;;  %v1773_v46 = vadd.f32 %v1763_v53, %v1729_v4  ;;  %v1764_v31 = vmul.f32 %v3055_v12, %v1616_v41  ;;  %v1560_v36 = vpop.f32.mrb[8].mxu0 }
 0x1a2   : > { %v2294_v47 = vpop.f32.mrb[31].mxu1  ;;  %v2307_v48 = vadd.f32 %v1560_v36, %v3037_v55  ;;  %v2271_v49 = vpop.f32.mrb[9].mxu0  ;;  %v1740_v16 = vadd.f32 %v3052_v20, %v1739_v3 }
 0x1a3   : > { %1783 = vst.msk [vmem:[%s3062_s15 + $0x10] sm:$0xff] %vm429_vm4, %v1773_v46  ;;  %v1774_v23 = vadd.f32 %v1764_v31, %v1732_v6  ;;  %v1563_v50 = vpop.f32.mrb[10].mxu0 }
 0x1a4   : > { %vm1597_vm15 = vcmp.ge.f32.partialorder %v2307_v48, 0.0  ;;  %v1607_v51 = vmul.f32 0.2, %v2307_v48  ;;  %v2308_v52 = vadd.f32 %v1563_v50, %v3039_v57  ;;  %v2272_v14 = vpop.f32.mrb[11].mxu0 }
 0x1a5   : > { %1784 = vst.msk [vmem:[%s3062_s15 + $0x18] sm:$0xff] %vm429_vm4, %v1774_v23 }
 0x1a6   : > { %v1617_v24 = vsel %vm1597_vm15, %v2307_v48, %v1607_v51  ;;  %vm1598_vm0 = vcmp.ge.f32.partialorder %v2308_v52, 0.0  ;;  %v1608_v43 = vmul.f32 0.2, %v2308_v52 }
 0x1a7   : > { %v1744_v61 = vpop.f32.mrb[32].mxu1  ;;  %v1765_v55 = vmul.f32 %v3055_v12, %v1617_v24 }
 0x1a8   : > { %v2297_v59 = vpop.f32.mrb[33].mxu1  ;;  %v1618_v27 = vsel %vm1598_vm0, %v2308_v52, %v1608_v43  ;;  %v1745_v10 = vadd.f32 %v3052_v20, %v1744_v61 }
 0x1a9   : > { %v1747_v62 = vpop.f32.mrb[34].mxu1  ;;  %v1775_v45 = vadd.f32 %v1765_v55, %v1737_v2  ;;  %v1766_v57 = vmul.f32 %v3055_v12, %v1618_v27  ;;  %v1568_v63 = vpop.f32.mrb[12].mxu0 }
 0x1aa   : > { %v2298_v5 = vpop.f32.mrb[35].mxu1  ;;  %v2309_v9 = vadd.f32 %v1568_v63, %v3041_v58  ;;  %v2275_v32 = vpop.f32.mrb[13].mxu0  ;;  %v1748_v33 = vadd.f32 %v3052_v20, %v1747_v62 }
 0x1ab   : > { %1785 = vst.msk [vmem:[%s3062_s15 + $0x20] sm:$0xff] %vm429_vm4, %v1775_v45  ;;  %v1776_v1 = vadd.f32 %v1766_v57, %v1740_v16  ;;  %v1571_v11 = vpop.f32.mrb[14].mxu0 }
 0x1ac   : > { %vm1599_vm1 = vcmp.ge.f32.partialorder %v2309_v9, 0.0  ;;  %v1609_v13 = vmul.f32 0.2, %v2309_v9  ;;  %v2310_v18 = vadd.f32 %v1571_v11, %v3043_v60  ;;  %v2276_v35 = vpop.f32.mrb[15].mxu0 }
 0x1ad   : > { %1786 = vst.msk [vmem:[%s3062_s15 + $0x28] sm:$0xff] %vm429_vm4, %v1776_v1 }
 0x1ae   : > { %v1619_v22 = vsel %vm1599_vm1, %v2309_v9, %v1609_v13  ;;  %vm1600_vm2 = vcmp.ge.f32.partialorder %v2310_v18, 0.0  ;;  %v1610_v28 = vmul.f32 0.2, %v2310_v18 }
 0x1af   : > { %v1752_v29 = vpop.f32.mrb[36].mxu1  ;;  %v1767_v58 = vmul.f32 %v3055_v12, %v1619_v22 }
 0x1b0   : > { %v2301_v19 = vpop.f32.mrb[37].mxu1  ;;  %v1620_v30 = vsel %vm1600_vm2, %v2310_v18, %v1610_v28  ;;  %v1753_v4 = vadd.f32 %v3052_v20, %v1752_v29 }
 0x1b1   : > { %v1755_v40 = vpop.f32.mrb[38].mxu1  ;;  %v1777_v15 = vadd.f32 %v1767_v58, %v1745_v10  ;;  %v1768_v60 = vmul.f32 %v3055_v12, %v1620_v30  ;;  %v1576_v34 = vpop.f32.mrb[16].mxu0 }
 0x1b2   : > { %v2302_v7 = vpop.f32.mrb[39].mxu1  ;;  %v2311_v37 = vadd.f32 %v1576_v34, %v3045_v21  ;;  %v2279_v0 = vpop.f32.mrb[17].mxu0  ;;  %v1756_v56 = vadd.f32 %v3052_v20, %v1755_v40 }
 0x1b3   : > { %1787 = vst.msk [vmem:[%s3062_s15 + $0x30] sm:$0xff] %vm429_vm4, %v1777_v15  ;;  %v1778_v44 = vadd.f32 %v1768_v60, %v1748_v33  ;;  %v1579_v26 = vpop.f32.mrb[18].mxu0 }
 0x1b4   : > { %vm1601_vm3 = vcmp.ge.f32.partialorder %v2311_v37, 0.0  ;;  %v1611_v39 = vmul.f32 0.2, %v2311_v37  ;;  %v2312_v8 = vadd.f32 %v1579_v26, %v3047_v25  ;;  %v2280_v38 = vpop.f32.mrb[19].mxu0 }
 0x1b5   : > { %1788 = vst.msk [vmem:[%s3062_s15 + $0x38] sm:$0xff] %vm429_vm4, %v1778_v44 }
 0x1b6   : > { %v1621_v54 = vsel %vm1601_vm3, %v2311_v37, %v1611_v39  ;;  %vm1602_vm5 = vcmp.ge.f32.partialorder %v2312_v8, 0.0  ;;  %v1612_v42 = vmul.f32 0.2, %v2312_v8 }
 0x1b7   : > { %v1769_v21 = vmul.f32 %v3055_v12, %v1621_v54 }
 0x1b8   : > { %v1622_v17 = vsel %vm1602_vm5, %v2312_v8, %v1612_v42 }
 0x1b9   : > { %v1779_v53 = vadd.f32 %v1769_v21, %v1753_v4  ;;  %v1770_v41 = vmul.f32 %v3055_v12, %v1622_v17 }
 0x1bb   : > { %1789 = vst.msk [vmem:[%s3062_s15 + $0x40] sm:$0xff] %vm429_vm4, %v1779_v53  ;;  %v1780_v3 = vadd.f32 %v1770_v41, %v1756_v56 }
 0x1bd   : > { %1790 = vst.msk [vmem:[%s3062_s15 + $0x48] sm:$0xff] %vm429_vm4, %v1780_v3 }
 0x1be PF: > { %s17_s25 = sadd.s32 1, %s2532_s25   ;;  %s3124_s23 = smov %s2528_s24 }
 0x1bf   : > { %p14_p5 = scmp.ge.s32.totalorder %s17_s25, 4   ;;  %s3125_s24 = smov %s3127_s5 }
 0x1c1   :  { %16 = sbr.rel (!%p14_p5) target bundleno = 2 (0x2), region = 94 }

</bundles_post_ra>
